<compile_context>
chip_gen: v6e
topology: v6e:2x2x1
jax: 0.10.0
libtpu: 0.0.40
codegen_flags: <defaults>
</compile_context>

<pallas_src>
import numpy as np
import jax
import jax.numpy as jnp
from jax.experimental import pallas as pl
from jax.experimental.pallas import tpu as pltpu

# Hyper-parameters consistent with the module's __init__ signature.
IN_MODES = 4
OUT_MODES = 4
WIDTH = 8
IN_CHANNELS = 4
OUT_CHANNELS = 6
SIGNAL_LENGTH = 16
DIM_ADD = 4
N_BLOCKS = 4
BATCH = 2

H = IN_CHANNELS                      # spatial "height" of the feature map
W = SIGNAL_LENGTH                    # spatial "width"
HW = H * W                           # 64
NM = OUT_MODES * IN_MODES            # 16
OUT_LEN = SIGNAL_LENGTH + DIM_ADD    # 20
TAIL_COLS = OUT_CHANNELS * OUT_LEN   # 120
TAIL_PAD = ((TAIL_COLS + 127) // 128) * 128   # 128 -> lane-dense output slab
BHW = BATCH * HW                     # 128 = lane width of the activations
BNM = BATCH * NM                     # 32

# Layout assumptions made explicit (the kernel is written for these shapes).
assert WIDTH == 8, "channel-major layout assumes width == 8 sublanes"
assert BHW == 128, "lane layout assumes B*H*W == 128"
assert BNM == 32, "coefficient lane width assumed to be 32"

_GELU_C = 0.7978845608028654  # sqrt(2/pi)


def _gelu(v):
    # tanh-approximate GELU (EUP tanh path, shorter dependent chain than erf).
    # Flagged numerics change vs torch's default erf-form F.gelu (~1e-3 max dev).
    return 0.5 * v * (1.0 + jnp.tanh(_GELU_C * (v + 0.044715 * (v * v * v))))


def _gelu_np(v):
    return 0.5 * v * (1.0 + np.tanh(_GELU_C * (v + 0.044715 * v ** 3)))


# TODO(synk): SVDOperation2d source was not provided with the module; reconstructed as a
# learned low-rank (SVD-style) separable spatial transform + per-mode channel mixing +
# 1x1 channel bypass + GELU (FNO-block style). The reference below encodes the same math.
def _svd2d_kernel(x_ref, slab_ref, tf_ref, wm_ref, cmat_ref, tail_ref, tailb_ref, out_ref):
    # slab_ref rows (all 128 lanes wide, sublane-tile aligned):
    #   [0:8]   w0 (fc0 weight, pre-broadcast)     [8:16]  b0
    #   [16+32i : 48+32i]  Tb_bd for block i (32,128)
    #   [144+8i : 152+8i]  bc    for block i (8,128, pre-broadcast)
    #   [176:184] b1 (fc1 bias, pre-broadcast)
    w0 = slab_ref[0:8, :]
    b0 = slab_ref[8:16, :]

    # fc0: Linear(1 -> width), pointwise; channel-major (C=8, B*H*W=128) -> full lanes
    u = w0 * x_ref[...] + b0                                               # (8, 128)

    for i in range(N_BLOCKS):                                              # unrolled
        tb_i = slab_ref[16 + 32 * i: 48 + 32 * i, :]                       # (32, 128)
        bc_i = slab_ref[144 + 8 * i: 152 + 8 * i, :]                       # (8, 128)
        wc_i = cmat_ref[8 * i: 8 * (i + 1), :]                             # (8, 8)

        # forward separable transform (batch-block-diagonal): (8,128)@(128,32)
        coeffs = jnp.dot(u, tf_ref[i], preferred_element_type=jnp.float32)  # (8, 32)
        # per-mode channel mix in the (C, O, B*NM) layout; reduce over leading C
        mixed = jnp.sum(coeffs[:, None, :] * wm_ref[i], axis=0)             # (8, 32)
        # inverse separable transform back to channel-major: (8,32)@(32,128)
        spec = jnp.dot(mixed, tb_i, preferred_element_type=jnp.float32)     # (8, 128)
        # 1x1 bypass conv as a channel matmul on the MXU: (8,8)@(8,128)
        byp = jnp.dot(wc_i, u, preferred_element_type=jnp.float32)          # (8, 128)
        u = _gelu(spec + byp + bc_i)

    w1 = cmat_ref[32:40, :]                                                 # (8, 8)
    b1 = slab_ref[176:184, :]                                               # (8, 128)
    w2 = cmat_ref[40:41, :]                                                 # (1, 8)

    # fc1 (width -> width) as a channel matmul + GELU
    y = _gelu(jnp.dot(w1, u, preferred_element_type=jnp.float32) + b1)      # (8, 128)
    # fc2 (width -> 1); its bias is folded into the fused tail bias
    z = jnp.dot(w2, y, preferred_element_type=jnp.float32)                  # (1, 128)
    # fused fc2-bias/fc3/fc4 tail: both permutes + both matmuls + all biases composed
    # into one batch-block-diagonal operator -> single lane-dense (1, 256) store
    out = jnp.dot(z, tail_ref[...], preferred_element_type=jnp.float32) + tailb_ref[...]
    out_ref[...] = out.astype(out_ref.dtype)                                # (1, 256)


def prepare_operands(params):
    """One-time host-side parameter composition -> packed kernel operands.

    Pure layout/algebra preprocessing (mathematically identical to the original op
    sequence). Call ONCE at setup; do NOT put this in the per-forward path.
    """
    f32 = np.float32
    p = {k: np.asarray(v, f32) for k, v in params.items()}
    B, C = BATCH, WIDTH
    eye_b = np.eye(B, dtype=f32)

    # separable spatial operators: T_fwd[(h,w),(n,m)] = U[h,m]*V[w,n], then batch-block-diag
    tf = np.einsum('khm,kwn->khwnm', p['Us'], p['Vs']).reshape(N_BLOCKS, HW, NM)
    tf_bd = np.stack([np.kron(eye_b, tf[i]) for i in range(N_BLOCKS)]).astype(f32)  # (4,128,32)
    tb_bd = np.ascontiguousarray(np.transpose(tf_bd, (0, 2, 1)))                    # (4,32,128)

    # per-mode channel mixing weights, replicated over batch along the lane axis
    wm = p['Wmix'].reshape(N_BLOCKS, C, C, NM)
    wm_all = np.ascontiguousarray(
        np.tile(wm[:, :, :, None, :], (1, 1, 1, B, 1)).reshape(N_BLOCKS, C, C, BNM)
    ).astype(f32)                                                                    # (4,8,8,32)

    # 128-lane parameter slab
    slab = np.zeros((184, 128), f32)
    slab[0:8] = np.broadcast_to(p['w0'][:, 0, 0][:, None], (C, 128))
    slab[8:16] = np.broadcast_to(p['b0'][:, 0, 0][:, None], (C, 128))
    for i in range(N_BLOCKS):
        slab[16 + 32 * i: 48 + 32 * i] = tb_bd[i]
        slab[144 + 8 * i: 152 + 8 * i] = np.broadcast_to(
            p['bcs'][i, :, 0, 0][:, None], (C, 128))
    slab[176:184] = np.broadcast_to(p['fc1b'][:, 0, 0][:, None], (C, 128))

    # 8-lane channel-matmul slab: Wc x4, fc1 weight, fc2 weight (zero-padded rows)
    cmat = np.zeros((48, C), f32)
    for i in range(N_BLOCKS):
        cmat[8 * i: 8 * (i + 1)] = p['Wcs'][i, :, :, 0, 0]
    cmat[32:40] = p['fc1w'][:, :, 0, 0]
    cmat[40] = p['fc2w'][:, 0, 0]

    # fused fc3/fc4 tail: out[b,(o,l)] = sum_{h,w} z[b,(h,w)] * fc3wt[h,o]*fc4wt[w,l] + bias
    tail = np.einsum('ho,wl->hwol', p['fc3wt'], p['fc4wt']).reshape(HW, TAIL_COLS)
    bias = (p['fc3b'][0][:, None] * p['fc4wt'].sum(axis=0)[None, :]
            + p['fc4b'][0][None, :]).reshape(1, TAIL_COLS)
    tail_pad = np.zeros((HW, TAIL_PAD), f32)
    tail_pad[:, :TAIL_COLS] = tail
    bias_pad = np.zeros((1, TAIL_PAD), f32)
    bias_pad[:, :TAIL_COLS] = bias
    # fold the fc2 bias (added to every (b,h,w) of z) into the fused tail bias
    bias_pad += float(p['fc2b'][0, 0]) * tail_pad.sum(axis=0, keepdims=True)
    tail_bd = np.kron(eye_b, tail_pad).astype(f32)             # (128, 256)
    tailb_bd = np.tile(bias_pad, (1, B)).astype(f32)            # (1, 256)

    ops = {'slab': slab, 'tf': tf_bd, 'wm': wm_all, 'cmat': cmat,
           'tail': tail_bd, 'tail_b': tailb_bd}
    return {k: jnp.asarray(v) for k, v in ops.items()}          # device-resident, once


@jax.jit
def svd2d_forward(x, ops):
    B = x.shape[0]
    # wrapper-side layout plumbing only: batch folded onto the lane axis -> (1, B*H*W)
    x_flat = x.reshape(1, B * HW).astype(jnp.float32)

    vmem = pl.BlockSpec(memory_space=pltpu.MemorySpace.VMEM)    # whole array in VMEM
    out_flat = pl.pallas_call(
        _svd2d_kernel,
        out_shape=jax.ShapeDtypeStruct((1, B * TAIL_PAD), jnp.float32),
        in_specs=[vmem] * 7,
        out_specs=vmem,
    )(x_flat, ops['slab'], ops['tf'], ops['wm'], ops['cmat'], ops['tail'], ops['tail_b'])

    # per-batch unpack + lane-padding slice on HBM (free relative to the kernel)
    out = out_flat.reshape(B, TAIL_PAD)[:, :TAIL_COLS]
    return out.reshape(B, OUT_CHANNELS, OUT_LEN)


def init_params(key):
    ks = jax.random.split(key, 16)

    def nrm(k, shape, scale):
        return (scale * jax.random.normal(k, shape)).astype(jnp.float32)

    p = {}
    p['w0'] = nrm(ks[0], (WIDTH, 1, 1), 1.0)
    p['b0'] = nrm(ks[1], (WIDTH, 1, 1), 0.1)
    p['Us'] = nrm(ks[2], (N_BLOCKS, IN_CHANNELS, IN_MODES), 1.0 / np.sqrt(IN_CHANNELS))
    p['Vs'] = nrm(ks[3], (N_BLOCKS, SIGNAL_LENGTH, OUT_MODES), 1.0 / np.sqrt(SIGNAL_LENGTH))
    p['Wmix'] = nrm(ks[4], (N_BLOCKS, WIDTH, WIDTH, OUT_MODES, IN_MODES), 1.0 / WIDTH)
    p['Wcs'] = nrm(ks[5], (N_BLOCKS, WIDTH, WIDTH, 1, 1), 1.0 / np.sqrt(WIDTH))
    p['bcs'] = nrm(ks[6], (N_BLOCKS, WIDTH, 1, 1), 0.1)
    p['fc1w'] = nrm(ks[7], (WIDTH, WIDTH, 1, 1), 1.0 / np.sqrt(WIDTH))
    p['fc1b'] = nrm(ks[8], (WIDTH, 1, 1), 0.1)
    p['fc2w'] = nrm(ks[9], (WIDTH, 1, 1), 1.0 / np.sqrt(WIDTH))
    p['fc2b'] = nrm(ks[10], (1, 1), 0.1)
    p['fc3wt'] = nrm(ks[11], (IN_CHANNELS, OUT_CHANNELS), 1.0 / np.sqrt(IN_CHANNELS))
    p['fc3b'] = nrm(ks[12], (1, OUT_CHANNELS), 0.1)
    p['fc4wt'] = nrm(ks[13], (SIGNAL_LENGTH, SIGNAL_LENGTH + DIM_ADD), 1.0 / np.sqrt(SIGNAL_LENGTH))
    p['fc4b'] = nrm(ks[14], (1, SIGNAL_LENGTH + DIM_ADD), 0.1)
    return p


def reference_forward_np(x, params):
    """Host-side float64 numpy reference of the same math in the original op ordering."""
    f64 = np.float64
    p = {k: np.asarray(v, f64) for k, v in params.items()}
    x = np.asarray(x, f64)
    w0 = p['w0'][:, 0, 0]
    b0 = p['b0'][:, 0, 0]
    u = x[:, None, :, :] * w0[None, :, None, None] + b0[None, :, None, None]  # (B, width, H, W)
    for i in range(N_BLOCKS):
        U = p['Us'][i]
        V = p['Vs'][i]
        wmix = p['Wmix'][i]                          # (C, O, N, M)
        wc = p['Wcs'][i][:, :, 0, 0]                 # (O, C)
        bc = p['bcs'][i][:, 0, 0]                    # (O,)
        coeffs = np.einsum('bchw,hm,wn->bcnm', u, U, V)
        mixed = np.einsum('bcnm,conm->bonm', coeffs, wmix)
        spec = np.einsum('bonm,hm,wn->bohw', mixed, U, V)
        byp = np.einsum('oc,bchw->bohw', wc, u) + bc[None, :, None, None]
        u = _gelu_np(spec + byp)
    w1 = p['fc1w'][:, :, 0, 0]
    b1 = p['fc1b'][:, 0, 0]
    y = _gelu_np(np.einsum('dc,bchw->bdhw', w1, u) + b1[None, :, None, None])
    w2 = p['fc2w'][:, 0, 0]
    z = np.einsum('d,bdhw->bhw', w2, y) + p['fc2b'][0, 0]
    zt = np.transpose(z, (0, 2, 1))                  # (B, W, H)
    o3 = zt @ p['fc3wt'] + p['fc3b'][0]              # (B, W, out_c)
    o3t = np.transpose(o3, (0, 2, 1))                # (B, out_c, W)
    out = o3t @ p['fc4wt'] + p['fc4b'][0]            # (B, out_c, W+da)
    return out


if __name__ == "__main__":
    key = jax.random.PRNGKey(0)
    kx, kparam = jax.random.split(key)
    x = jax.random.normal(kx, (BATCH, IN_CHANNELS, SIGNAL_LENGTH), dtype=jnp.float32)
    params = init_params(kparam)

    # One-time parameter composition (hoisted out of the per-call path).
    ops = prepare_operands(params)

    out = svd2d_forward(x, ops)
    out = jax.block_until_ready(out)
    assert out.shape == (BATCH, OUT_CHANNELS, OUT_LEN)

    # Tolerance tightened from 1e-2 to 2e-3: the fusion algebra is exact; the margin
    # only covers f32 MXU accumulation-order differences vs the float64 host reference.
    ref = reference_forward_np(np.asarray(x), params)
    np.testing.assert_allclose(np.asarray(out), np.asarray(ref, np.float32),
                               rtol=2e-3, atol=2e-3)

    print("KERNEL_OK")
</pallas_src>

<mosaic_0001>
module attributes {stable_mosaic.version = 11 : i64} {
  func.func @_svd2d_kernel(%arg0: memref<1x128xf32, #tpu.memory_space<vmem>>, %arg1: memref<184x128xf32, #tpu.memory_space<vmem>>, %arg2: memref<4x128x32xf32, #tpu.memory_space<vmem>>, %arg3: memref<4x8x8x32xf32, #tpu.memory_space<vmem>>, %arg4: memref<48x8xf32, #tpu.memory_space<vmem>>, %arg5: memref<128x256xf32, #tpu.memory_space<vmem>>, %arg6: memref<1x256xf32, #tpu.memory_space<vmem>>, %arg7: memref<1x256xf32, #tpu.memory_space<vmem>>) attributes {dimension_semantics = [], scalar_prefetch = 0 : i64, scratch_operands = 0 : i64, tpu.core_type = #tpu.core_type<tc>} {
    %c0 = arith.constant 0 : index
    %c0_0 = arith.constant 0 : index
    %0 = vector.load %arg1[%c0, %c0_0] : memref<184x128xf32, #tpu.memory_space<vmem>>, vector<8x128xf32>
    %c8 = arith.constant 8 : index
    %c0_1 = arith.constant 0 : index
    %1 = vector.load %arg1[%c8, %c0_1] : memref<184x128xf32, #tpu.memory_space<vmem>>, vector<8x128xf32>
    %c0_2 = arith.constant 0 : index
    %c0_3 = arith.constant 0 : index
    %2 = vector.load %arg0[%c0_2, %c0_3] : memref<1x128xf32, #tpu.memory_space<vmem>>, vector<1x128xf32>
    %3 = vector.broadcast %2 : vector<1x128xf32> to vector<8x128xf32>
    %4 = arith.mulf %0, %3 : vector<8x128xf32>
    %5 = arith.addf %4, %1 : vector<8x128xf32>
    %c16 = arith.constant 16 : index
    %c0_4 = arith.constant 0 : index
    %6 = vector.load %arg1[%c16, %c0_4] : memref<184x128xf32, #tpu.memory_space<vmem>>, vector<32x128xf32>
    %c144 = arith.constant 144 : index
    %c0_5 = arith.constant 0 : index
    %7 = vector.load %arg1[%c144, %c0_5] : memref<184x128xf32, #tpu.memory_space<vmem>>, vector<8x128xf32>
    %c0_6 = arith.constant 0 : index
    %c0_7 = arith.constant 0 : index
    %8 = vector.load %arg4[%c0_6, %c0_7] : memref<48x8xf32, #tpu.memory_space<vmem>>, vector<8x8xf32>
    %c0_8 = arith.constant 0 : index
    %c0_9 = arith.constant 0 : index
    %c0_10 = arith.constant 0 : index
    %9 = vector.load %arg2[%c0_8, %c0_9, %c0_10] : memref<4x128x32xf32, #tpu.memory_space<vmem>>, vector<1x128x32xf32>
    %10 = vector.shape_cast %9 : vector<1x128x32xf32> to vector<128x32xf32>
    %cst = arith.constant dense<0.000000e+00> : vector<8x32xf32>
    %11 = tpu.matmul %5, %10, %cst {dimension_numbers = #tpu.dot_dimension_numbers<[1], [0], [0], [1], [0, 0, 1, 1], [], []>} : vector<8x128xf32>, vector<128x32xf32>, vector<8x32xf32> -> vector<8x32xf32>
    %12 = vector.shape_cast %11 : vector<8x32xf32> to vector<8x1x32xf32>
    %c0_11 = arith.constant 0 : index
    %c0_12 = arith.constant 0 : index
    %c0_13 = arith.constant 0 : index
    %c0_14 = arith.constant 0 : index
    %13 = vector.load %arg3[%c0_11, %c0_12, %c0_13, %c0_14] : memref<4x8x8x32xf32, #tpu.memory_space<vmem>>, vector<1x8x8x32xf32>
    %14 = vector.shape_cast %13 : vector<1x8x8x32xf32> to vector<8x8x32xf32>
    %15 = vector.broadcast %12 : vector<8x1x32xf32> to vector<8x8x32xf32>
    %16 = arith.mulf %15, %14 : vector<8x8x32xf32>
    %cst_15 = arith.constant dense<0.000000e+00> : vector<8x32xf32>
    %17 = vector.multi_reduction <add>, %16, %cst_15 [0] : vector<8x8x32xf32> to vector<8x32xf32>
    %cst_16 = arith.constant dense<0.000000e+00> : vector<8x128xf32>
    %18 = tpu.matmul %17, %6, %cst_16 {dimension_numbers = #tpu.dot_dimension_numbers<[1], [0], [0], [1], [0, 0, 1, 1], [], []>} : vector<8x32xf32>, vector<32x128xf32>, vector<8x128xf32> -> vector<8x128xf32>
    %cst_17 = arith.constant dense<0.000000e+00> : vector<8x128xf32>
    %19 = tpu.matmul %8, %5, %cst_17 {dimension_numbers = #tpu.dot_dimension_numbers<[1], [0], [0], [1], [0, 0, 1, 1], [], []>} : vector<8x8xf32>, vector<8x128xf32>, vector<8x128xf32> -> vector<8x128xf32>
    %20 = arith.addf %18, %19 : vector<8x128xf32>
    %21 = arith.addf %20, %7 : vector<8x128xf32>
    %cst_18 = arith.constant 5.000000e-01 : f32
    %22 = vector.broadcast %cst_18 : f32 to vector<8x128xf32>
    %23 = arith.mulf %22, %21 : vector<8x128xf32>
    %24 = arith.mulf %21, %21 : vector<8x128xf32>
    %25 = arith.mulf %24, %21 : vector<8x128xf32>
    %cst_19 = arith.constant 4.471500e-02 : f32
    %26 = vector.broadcast %cst_19 : f32 to vector<8x128xf32>
    %27 = arith.mulf %26, %25 : vector<8x128xf32>
    %28 = arith.addf %21, %27 : vector<8x128xf32>
    %cst_20 = arith.constant 0.797884583 : f32
    %29 = vector.broadcast %cst_20 : f32 to vector<8x128xf32>
    %30 = arith.mulf %29, %28 : vector<8x128xf32>
    %31 = math.tanh %30 : vector<8x128xf32>
    %cst_21 = arith.constant 1.000000e+00 : f32
    %32 = vector.broadcast %cst_21 : f32 to vector<8x128xf32>
    %33 = arith.addf %32, %31 : vector<8x128xf32>
    %34 = arith.mulf %23, %33 : vector<8x128xf32>
    %c48 = arith.constant 48 : index
    %c0_22 = arith.constant 0 : index
    %35 = vector.load %arg1[%c48, %c0_22] : memref<184x128xf32, #tpu.memory_space<vmem>>, vector<32x128xf32>
    %c152 = arith.constant 152 : index
    %c0_23 = arith.constant 0 : index
    %36 = vector.load %arg1[%c152, %c0_23] : memref<184x128xf32, #tpu.memory_space<vmem>>, vector<8x128xf32>
    %c8_24 = arith.constant 8 : index
    %c0_25 = arith.constant 0 : index
    %37 = vector.load %arg4[%c8_24, %c0_25] : memref<48x8xf32, #tpu.memory_space<vmem>>, vector<8x8xf32>
    %c1 = arith.constant 1 : index
    %c0_26 = arith.constant 0 : index
    %c0_27 = arith.constant 0 : index
    %38 = vector.load %arg2[%c1, %c0_26, %c0_27] : memref<4x128x32xf32, #tpu.memory_space<vmem>>, vector<1x128x32xf32>
    %39 = vector.shape_cast %38 : vector<1x128x32xf32> to vector<128x32xf32>
    %cst_28 = arith.constant dense<0.000000e+00> : vector<8x32xf32>
    %40 = tpu.matmul %34, %39, %cst_28 {dimension_numbers = #tpu.dot_dimension_numbers<[1], [0], [0], [1], [0, 0, 1, 1], [], []>} : vector<8x128xf32>, vector<128x32xf32>, vector<8x32xf32> -> vector<8x32xf32>
    %41 = vector.shape_cast %40 : vector<8x32xf32> to vector<8x1x32xf32>
    %c1_29 = arith.constant 1 : index
    %c0_30 = arith.constant 0 : index
    %c0_31 = arith.constant 0 : index
    %c0_32 = arith.constant 0 : index
    %42 = vector.load %arg3[%c1_29, %c0_30, %c0_31, %c0_32] : memref<4x8x8x32xf32, #tpu.memory_space<vmem>>, vector<1x8x8x32xf32>
    %43 = vector.shape_cast %42 : vector<1x8x8x32xf32> to vector<8x8x32xf32>
    %44 = vector.broadcast %41 : vector<8x1x32xf32> to vector<8x8x32xf32>
    %45 = arith.mulf %44, %43 : vector<8x8x32xf32>
    %cst_33 = arith.constant dense<0.000000e+00> : vector<8x32xf32>
    %46 = vector.multi_reduction <add>, %45, %cst_33 [0] : vector<8x8x32xf32> to vector<8x32xf32>
    %cst_34 = arith.constant dense<0.000000e+00> : vector<8x128xf32>
    %47 = tpu.matmul %46, %35, %cst_34 {dimension_numbers = #tpu.dot_dimension_numbers<[1], [0], [0], [1], [0, 0, 1, 1], [], []>} : vector<8x32xf32>, vector<32x128xf32>, vector<8x128xf32> -> vector<8x128xf32>
    %cst_35 = arith.constant dense<0.000000e+00> : vector<8x128xf32>
    %48 = tpu.matmul %37, %34, %cst_35 {dimension_numbers = #tpu.dot_dimension_numbers<[1], [0], [0], [1], [0, 0, 1, 1], [], []>} : vector<8x8xf32>, vector<8x128xf32>, vector<8x128xf32> -> vector<8x128xf32>
    %49 = arith.addf %47, %48 : vector<8x128xf32>
    %50 = arith.addf %49, %36 : vector<8x128xf32>
    %cst_36 = arith.constant 5.000000e-01 : f32
    %51 = vector.broadcast %cst_36 : f32 to vector<8x128xf32>
    %52 = arith.mulf %51, %50 : vector<8x128xf32>
    %53 = arith.mulf %50, %50 : vector<8x128xf32>
    %54 = arith.mulf %53, %50 : vector<8x128xf32>
    %cst_37 = arith.constant 4.471500e-02 : f32
    %55 = vector.broadcast %cst_37 : f32 to vector<8x128xf32>
    %56 = arith.mulf %55, %54 : vector<8x128xf32>
    %57 = arith.addf %50, %56 : vector<8x128xf32>
    %cst_38 = arith.constant 0.797884583 : f32
    %58 = vector.broadcast %cst_38 : f32 to vector<8x128xf32>
    %59 = arith.mulf %58, %57 : vector<8x128xf32>
    %60 = math.tanh %59 : vector<8x128xf32>
    %cst_39 = arith.constant 1.000000e+00 : f32
    %61 = vector.broadcast %cst_39 : f32 to vector<8x128xf32>
    %62 = arith.addf %61, %60 : vector<8x128xf32>
    %63 = arith.mulf %52, %62 : vector<8x128xf32>
    %c80 = arith.constant 80 : index
    %c0_40 = arith.constant 0 : index
    %64 = vector.load %arg1[%c80, %c0_40] : memref<184x128xf32, #tpu.memory_space<vmem>>, vector<32x128xf32>
    %c160 = arith.constant 160 : index
    %c0_41 = arith.constant 0 : index
    %65 = vector.load %arg1[%c160, %c0_41] : memref<184x128xf32, #tpu.memory_space<vmem>>, vector<8x128xf32>
    %c16_42 = arith.constant 16 : index
    %c0_43 = arith.constant 0 : index
    %66 = vector.load %arg4[%c16_42, %c0_43] : memref<48x8xf32, #tpu.memory_space<vmem>>, vector<8x8xf32>
    %c2 = arith.constant 2 : index
    %c0_44 = arith.constant 0 : index
    %c0_45 = arith.constant 0 : index
    %67 = vector.load %arg2[%c2, %c0_44, %c0_45] : memref<4x128x32xf32, #tpu.memory_space<vmem>>, vector<1x128x32xf32>
    %68 = vector.shape_cast %67 : vector<1x128x32xf32> to vector<128x32xf32>
    %cst_46 = arith.constant dense<0.000000e+00> : vector<8x32xf32>
    %69 = tpu.matmul %63, %68, %cst_46 {dimension_numbers = #tpu.dot_dimension_numbers<[1], [0], [0], [1], [0, 0, 1, 1], [], []>} : vector<8x128xf32>, vector<128x32xf32>, vector<8x32xf32> -> vector<8x32xf32>
    %70 = vector.shape_cast %69 : vector<8x32xf32> to vector<8x1x32xf32>
    %c2_47 = arith.constant 2 : index
    %c0_48 = arith.constant 0 : index
    %c0_49 = arith.constant 0 : index
    %c0_50 = arith.constant 0 : index
    %71 = vector.load %arg3[%c2_47, %c0_48, %c0_49, %c0_50] : memref<4x8x8x32xf32, #tpu.memory_space<vmem>>, vector<1x8x8x32xf32>
    %72 = vector.shape_cast %71 : vector<1x8x8x32xf32> to vector<8x8x32xf32>
    %73 = vector.broadcast %70 : vector<8x1x32xf32> to vector<8x8x32xf32>
    %74 = arith.mulf %73, %72 : vector<8x8x32xf32>
    %cst_51 = arith.constant dense<0.000000e+00> : vector<8x32xf32>
    %75 = vector.multi_reduction <add>, %74, %cst_51 [0] : vector<8x8x32xf32> to vector<8x32xf32>
    %cst_52 = arith.constant dense<0.000000e+00> : vector<8x128xf32>
    %76 = tpu.matmul %75, %64, %cst_52 {dimension_numbers = #tpu.dot_dimension_numbers<[1], [0], [0], [1], [0, 0, 1, 1], [], []>} : vector<8x32xf32>, vector<32x128xf32>, vector<8x128xf32> -> vector<8x128xf32>
    %cst_53 = arith.constant dense<0.000000e+00> : vector<8x128xf32>
    %77 = tpu.matmul %66, %63, %cst_53 {dimension_numbers = #tpu.dot_dimension_numbers<[1], [0], [0], [1], [0, 0, 1, 1], [], []>} : vector<8x8xf32>, vector<8x128xf32>, vector<8x128xf32> -> vector<8x128xf32>
    %78 = arith.addf %76, %77 : vector<8x128xf32>
    %79 = arith.addf %78, %65 : vector<8x128xf32>
    %cst_54 = arith.constant 5.000000e-01 : f32
    %80 = vector.broadcast %cst_54 : f32 to vector<8x128xf32>
    %81 = arith.mulf %80, %79 : vector<8x128xf32>
    %82 = arith.mulf %79, %79 : vector<8x128xf32>
    %83 = arith.mulf %82, %79 : vector<8x128xf32>
    %cst_55 = arith.constant 4.471500e-02 : f32
    %84 = vector.broadcast %cst_55 : f32 to vector<8x128xf32>
    %85 = arith.mulf %84, %83 : vector<8x128xf32>
    %86 = arith.addf %79, %85 : vector<8x128xf32>
    %cst_56 = arith.constant 0.797884583 : f32
    %87 = vector.broadcast %cst_56 : f32 to vector<8x128xf32>
    %88 = arith.mulf %87, %86 : vector<8x128xf32>
    %89 = math.tanh %88 : vector<8x128xf32>
    %cst_57 = arith.constant 1.000000e+00 : f32
    %90 = vector.broadcast %cst_57 : f32 to vector<8x128xf32>
    %91 = arith.addf %90, %89 : vector<8x128xf32>
    %92 = arith.mulf %81, %91 : vector<8x128xf32>
    %c112 = arith.constant 112 : index
    %c0_58 = arith.constant 0 : index
    %93 = vector.load %arg1[%c112, %c0_58] : memref<184x128xf32, #tpu.memory_space<vmem>>, vector<32x128xf32>
    %c168 = arith.constant 168 : index
    %c0_59 = arith.constant 0 : index
    %94 = vector.load %arg1[%c168, %c0_59] : memref<184x128xf32, #tpu.memory_space<vmem>>, vector<8x128xf32>
    %c24 = arith.constant 24 : index
    %c0_60 = arith.constant 0 : index
    %95 = vector.load %arg4[%c24, %c0_60] : memref<48x8xf32, #tpu.memory_space<vmem>>, vector<8x8xf32>
    %c3 = arith.constant 3 : index
    %c0_61 = arith.constant 0 : index
    %c0_62 = arith.constant 0 : index
    %96 = vector.load %arg2[%c3, %c0_61, %c0_62] : memref<4x128x32xf32, #tpu.memory_space<vmem>>, vector<1x128x32xf32>
    %97 = vector.shape_cast %96 : vector<1x128x32xf32> to vector<128x32xf32>
    %cst_63 = arith.constant dense<0.000000e+00> : vector<8x32xf32>
    %98 = tpu.matmul %92, %97, %cst_63 {dimension_numbers = #tpu.dot_dimension_numbers<[1], [0], [0], [1], [0, 0, 1, 1], [], []>} : vector<8x128xf32>, vector<128x32xf32>, vector<8x32xf32> -> vector<8x32xf32>
    %99 = vector.shape_cast %98 : vector<8x32xf32> to vector<8x1x32xf32>
    %c3_64 = arith.constant 3 : index
    %c0_65 = arith.constant 0 : index
    %c0_66 = arith.constant 0 : index
    %c0_67 = arith.constant 0 : index
    %100 = vector.load %arg3[%c3_64, %c0_65, %c0_66, %c0_67] : memref<4x8x8x32xf32, #tpu.memory_space<vmem>>, vector<1x8x8x32xf32>
    %101 = vector.shape_cast %100 : vector<1x8x8x32xf32> to vector<8x8x32xf32>
    %102 = vector.broadcast %99 : vector<8x1x32xf32> to vector<8x8x32xf32>
    %103 = arith.mulf %102, %101 : vector<8x8x32xf32>
    %cst_68 = arith.constant dense<0.000000e+00> : vector<8x32xf32>
    %104 = vector.multi_reduction <add>, %103, %cst_68 [0] : vector<8x8x32xf32> to vector<8x32xf32>
    %cst_69 = arith.constant dense<0.000000e+00> : vector<8x128xf32>
    %105 = tpu.matmul %104, %93, %cst_69 {dimension_numbers = #tpu.dot_dimension_numbers<[1], [0], [0], [1], [0, 0, 1, 1], [], []>} : vector<8x32xf32>, vector<32x128xf32>, vector<8x128xf32> -> vector<8x128xf32>
    %cst_70 = arith.constant dense<0.000000e+00> : vector<8x128xf32>
    %106 = tpu.matmul %95, %92, %cst_70 {dimension_numbers = #tpu.dot_dimension_numbers<[1], [0], [0], [1], [0, 0, 1, 1], [], []>} : vector<8x8xf32>, vector<8x128xf32>, vector<8x128xf32> -> vector<8x128xf32>
    %107 = arith.addf %105, %106 : vector<8x128xf32>
    %108 = arith.addf %107, %94 : vector<8x128xf32>
    %cst_71 = arith.constant 5.000000e-01 : f32
    %109 = vector.broadcast %cst_71 : f32 to vector<8x128xf32>
    %110 = arith.mulf %109, %108 : vector<8x128xf32>
    %111 = arith.mulf %108, %108 : vector<8x128xf32>
    %112 = arith.mulf %111, %108 : vector<8x128xf32>
    %cst_72 = arith.constant 4.471500e-02 : f32
    %113 = vector.broadcast %cst_72 : f32 to vector<8x128xf32>
    %114 = arith.mulf %113, %112 : vector<8x128xf32>
    %115 = arith.addf %108, %114 : vector<8x128xf32>
    %cst_73 = arith.constant 0.797884583 : f32
    %116 = vector.broadcast %cst_73 : f32 to vector<8x128xf32>
    %117 = arith.mulf %116, %115 : vector<8x128xf32>
    %118 = math.tanh %117 : vector<8x128xf32>
    %cst_74 = arith.constant 1.000000e+00 : f32
    %119 = vector.broadcast %cst_74 : f32 to vector<8x128xf32>
    %120 = arith.addf %119, %118 : vector<8x128xf32>
    %121 = arith.mulf %110, %120 : vector<8x128xf32>
    %c32 = arith.constant 32 : index
    %c0_75 = arith.constant 0 : index
    %122 = vector.load %arg4[%c32, %c0_75] : memref<48x8xf32, #tpu.memory_space<vmem>>, vector<8x8xf32>
    %c176 = arith.constant 176 : index
    %c0_76 = arith.constant 0 : index
    %123 = vector.load %arg1[%c176, %c0_76] : memref<184x128xf32, #tpu.memory_space<vmem>>, vector<8x128xf32>
    %c40 = arith.constant 40 : index
    %c0_77 = arith.constant 0 : index
    %124 = vector.load %arg4[%c40, %c0_77] : memref<48x8xf32, #tpu.memory_space<vmem>>, vector<1x8xf32>
    %cst_78 = arith.constant dense<0.000000e+00> : vector<8x128xf32>
    %125 = tpu.matmul %122, %121, %cst_78 {dimension_numbers = #tpu.dot_dimension_numbers<[1], [0], [0], [1], [0, 0, 1, 1], [], []>} : vector<8x8xf32>, vector<8x128xf32>, vector<8x128xf32> -> vector<8x128xf32>
    %126 = arith.addf %125, %123 : vector<8x128xf32>
    %cst_79 = arith.constant 5.000000e-01 : f32
    %127 = vector.broadcast %cst_79 : f32 to vector<8x128xf32>
    %128 = arith.mulf %127, %126 : vector<8x128xf32>
    %129 = arith.mulf %126, %126 : vector<8x128xf32>
    %130 = arith.mulf %129, %126 : vector<8x128xf32>
    %cst_80 = arith.constant 4.471500e-02 : f32
    %131 = vector.broadcast %cst_80 : f32 to vector<8x128xf32>
    %132 = arith.mulf %131, %130 : vector<8x128xf32>
    %133 = arith.addf %126, %132 : vector<8x128xf32>
    %cst_81 = arith.constant 0.797884583 : f32
    %134 = vector.broadcast %cst_81 : f32 to vector<8x128xf32>
    %135 = arith.mulf %134, %133 : vector<8x128xf32>
    %136 = math.tanh %135 : vector<8x128xf32>
    %cst_82 = arith.constant 1.000000e+00 : f32
    %137 = vector.broadcast %cst_82 : f32 to vector<8x128xf32>
    %138 = arith.addf %137, %136 : vector<8x128xf32>
    %139 = arith.mulf %128, %138 : vector<8x128xf32>
    %cst_83 = arith.constant dense<0.000000e+00> : vector<1x128xf32>
    %140 = tpu.matmul %124, %139, %cst_83 {dimension_numbers = #tpu.dot_dimension_numbers<[1], [0], [0], [1], [0, 0, 1, 1], [], []>} : vector<1x8xf32>, vector<8x128xf32>, vector<1x128xf32> -> vector<1x128xf32>
    %c0_84 = arith.constant 0 : index
    %c0_85 = arith.constant 0 : index
    %141 = vector.load %arg5[%c0_84, %c0_85] : memref<128x256xf32, #tpu.memory_space<vmem>>, vector<128x256xf32>
    %cst_86 = arith.constant dense<0.000000e+00> : vector<1x256xf32>
    %142 = tpu.matmul %140, %141, %cst_86 {dimension_numbers = #tpu.dot_dimension_numbers<[1], [0], [0], [1], [0, 0, 1, 1], [], []>} : vector<1x128xf32>, vector<128x256xf32>, vector<1x256xf32> -> vector<1x256xf32>
    %c0_87 = arith.constant 0 : index
    %c0_88 = arith.constant 0 : index
    %143 = vector.load %arg6[%c0_87, %c0_88] : memref<1x256xf32, #tpu.memory_space<vmem>>, vector<1x256xf32>
    %144 = arith.addf %142, %143 : vector<1x256xf32>
    %c0_89 = arith.constant 0 : index
    %c0_90 = arith.constant 0 : index
    %145 = vector.load %arg7[%c0_89, %c0_90] : memref<1x256xf32, #tpu.memory_space<vmem>>, vector<1x256xf32>
    tpu.vector_store %arg7[%c0_89, %c0_90], %144 {strides = array<i32>} : memref<1x256xf32, #tpu.memory_space<vmem>>, vector<1x256xf32>,
    return
  }
}

</mosaic_0001>

<bundles_post_ra>
// kernel: svd2d_forward.1
= control target key start
LH: loop header
LB: loop body
LE: loop exit
PB: predicated region body
PF: predicated region fallthrough
CT: control target
= control target key end

     0   :  { %v2231_v0 = vmov 0.0   ;;  %vm2232_vm0 = vmmov 0   ;;  %vm251_vm1 = vcmask 64512   ;;  %v2233_v27 = vmov 1966171168   ;;  %s2981_s2 = inlined_call_operand.vmem [shape: f32[4,128,32], index: 2, kind: input, shape index: {}]   ;;  %s2982_s1 = inlined_call_operand.vmem [shape: f32[184,128], index: 1, kind: input, shape index: {}]   ;;  %s2983_s0 = inlined_call_operand.vmem [shape: f32[1,128], index: 0, kind: input, shape index: {}]   ;;  %s2984_s4 = inlined_call_operand.vmem [shape: f32[48,8], index: 4, kind: input, shape index: {}]   ;;  %s2985_s3 = inlined_call_operand.vmem [shape: f32[4,8,8,32], index: 3, kind: input, shape index: {}]   ;;  %s2986_s5 = inlined_call_operand.vmem [shape: f32[128,256], index: 5, kind: input, shape index: {}]   ;;  %s2987_s6 = inlined_call_operand.vmem [shape: f32[1,256], index: 6, kind: input, shape index: {}]   ;;  %s2988_s7 = inlined_call_operand.vmem [shape: f32[1,256], index: 7, kind: output, shape index: {}]  }
   0x1   :  { %2004 = vmatprep.subr.mxu0 %v2231_v0  ;;  %v58_v1 = vld [vmem:[%s2981_s2 + $0x78] sm:$0xff]  ;;  %v57_v2 = vld [vmem:[%s2981_s2 + $0x70] sm:$0xff]  ;;  %2036 = vmatprep.mubr.msk.f32.mxu0 %vm2232_vm0, %v2231_v0  ;;  %v56_v3 = vld [vmem:[%s2981_s2 + $0x68] sm:$0xff]  ;;  %v132_v28 = vunpack.c.l.s4 %v2233_v27  ;;  %v134_v29 = vlaneseq  ;;  %vm235_vm2 = vcmask 261120  }
   0x2   :  { %2005 = vmatpush3.msra.mxu0 %v58_v1  ;;  %2039 = vmatprep.subr.mxu1 %v2231_v0  ;;  %v55_v4 = vld [vmem:[%s2981_s2 + $0x60] sm:$0xff]  ;;  %v54_v6 = vld [vmem:[%s2981_s2 + $0x58] sm:$0xff]  ;;  %v27_v7 = vld [vmem:[%s2982_s1 + $0x8] sm:$0xff] }
   0x3   :  { %2006 = vmatprep.subr.mxu0 %v2231_v0  ;;  %2041 = vmatprep.mubr.msk.f32.mxu1 %vm2232_vm0, %v2231_v0  ;;  %v26_v5 = vld [vmem:[%s2982_s1] sm:$0xff]  ;;  %v53_v10 = vld [vmem:[%s2981_s2 + $0x50] sm:$0xff]  ;;  %v52_v12 = vld [vmem:[%s2981_s2 + $0x48] sm:$0xff]  ;;  %v133_v30 = vunpack.c.0.s8 %v132_v28  ;;  %v2379_v31 = vshrl.u32 %v134_v29, 7  ;;  %vm1814_vm3 = vcmp.lt.s32.totalorder %v134_v29, 256 }
   0x4   :  { %2007 = vmatpush3.msra.mxu0 %v57_v2  ;;  %v1821_v8 = vld [vmem:[%s2983_s0] ss:$0 sm:$0xff]  ;;  %v50_v14 = vld [vmem:[%s2981_s2 + $0x38] sm:$0xff]  ;;  %v49_v15 = vld [vmem:[%s2981_s2 + $0x30] sm:$0xff] }
   0x5   :  { %2008 = vmatprep.subr.mxu0 %v2231_v0  ;;  %v35_v9 = vmul.f32 %v1821_v8, %v26_v5  ;;  %v51_v13 = vld [vmem:[%s2981_s2 + $0x40] sm:$0xff]  ;;  %v48_v16 = vld [vmem:[%s2981_s2 + $0x28] sm:$0xff]  ;;  %v46_v18 = vld [vmem:[%s2981_s2 + $0x18] sm:$0xff]  ;;  %v2382_v32 = vsub.s32 %v133_v30, %v2379_v31  ;;  %v2386_v36 = vsub.s32 0, %v2379_v31 }
   0x6   :  { %2009 = vmatpush3.msra.mxu0 %v56_v3  ;;  %v47_v17 = vld [vmem:[%s2981_s2 + $0x20] sm:$0xff]  ;;  %v45_v19 = vld [vmem:[%s2981_s2 + $0x10] sm:$0xff]  ;;  %v44_v20 = vld [vmem:[%s2981_s2 + $0x8] sm:$0xff] }
   0x7   :  { %2010 = vmatprep.subr.mxu0 %v2231_v0  ;;  %v36_v11 = vadd.f32 %v35_v9, %v27_v7  ;;  %v43_v21 = vld [vmem:[%s2981_s2] sm:$0xff]  ;;  %v40_v22 = vld [vmem:[%s2982_s1 + $0x28] sm:$0xff]  ;;  %v38_v24 = vld [vmem:[%s2982_s1 + $0x18] sm:$0xff] }
   0x8   :  { %2011 = vmatpush3.msra.mxu0 %v55_v4  ;;  %v39_v23 = vld [vmem:[%s2982_s1 + $0x20] sm:$0xff]  ;;  %v37_v26 = vld [vmem:[%s2982_s1 + $0x10] sm:$0xff]  ;;  %v180_v49 = vld [vmem:[%s2985_s3 + $0x8] sm:$0xff] }
   0x9   :  { %2012 = vmatprep.subr.mxu0 %v2231_v0  ;;  %2040 = vmatpush3.msra.mxu1 %v36_v11  ;;  %v42_v25 = vld [vmem:[%s2984_s4] sm:$0xff]  ;;  %v181_v50 = vld [vmem:[%s2985_s3 + $0x10] sm:$0xff]  ;;  %v182_v54 = vld [vmem:[%s2985_s3 + $0x18] sm:$0xff] }
   0xa   :  { %2013 = vmatpush3.msra.mxu0 %v54_v6  ;;  %2055 = vmatprep.subr.mxu1 %v2231_v0  ;;  %v179_v44 = vld [vmem:[%s2985_s3] sm:$0xff]  ;;  %v184_v3 = vld [vmem:[%s2985_s3 + $0x28] sm:$0xff]  ;;  %v185_v8 = vld [vmem:[%s2985_s3 + $0x30] sm:$0xff] }
   0xb   :  { %2014 = vmatprep.subr.mxu0 %v2231_v0  ;;  %2042 = vmatmul.mubr.msk.f32.vlgmr.msra.gmra.mxu1 %vm251_vm1, %v42_v25  ;;  %v183_v61 = vld [vmem:[%s2985_s3 + $0x20] sm:$0xff]  ;;  %v1839_v27 = vld [vmem:[%s2981_s2 + $0xf8] sm:$0xff]  ;;  %v1838_v28 = vld [vmem:[%s2981_s2 + $0xf0] sm:$0xff] }
   0xc   :  { %2015 = vmatpush3.msra.mxu0 %v53_v10  ;;  %2087 = vmatprep.mubr.msk.f32.mxu1 %vm2232_vm0, %v2231_v0  ;;  %v1837_v30 = vld [vmem:[%s2981_s2 + $0xe8] sm:$0xff] }
   0xd   :  { %2016 = vmatprep.subr.mxu0 %v2231_v0  ;;  %2056 = vmatpush3.msra.mxu1 %v1839_v27 }
   0xe   :  { %2017 = vmatpush3.msra.mxu0 %v52_v12  ;;  %2057 = vmatprep.subr.mxu1 %v2231_v0 }
   0xf   :  { %2018 = vmatprep.subr.mxu0 %v2231_v0  ;;  %2058 = vmatpush3.msra.mxu1 %v1838_v28 }
  0x10   :  { %2019 = vmatpush3.msra.mxu0 %v51_v13  ;;  %v186_v13 = vld [vmem:[%s2985_s3 + $0x38] sm:$0xff]  ;;  %2059 = vmatprep.subr.mxu1 %v2231_v0 }
  0x11   :  { %2020 = vmatprep.subr.mxu0 %v2231_v0  ;;  %2060 = vmatpush3.msra.mxu1 %v1837_v30 }
  0x12   :  { %2021 = vmatpush3.msra.mxu0 %v50_v14  ;;  %2061 = vmatprep.subr.mxu1 %v2231_v0 }
  0x13   :  { %2022 = vmatprep.subr.mxu0 %v2231_v0 }
  0x14   :  { %2023 = vmatpush3.msra.mxu0 %v49_v15 }
  0x15   :  { %2024 = vmatprep.subr.mxu0 %v2231_v0 }
  0x16   :  { %2025 = vmatpush3.msra.mxu0 %v48_v16 }
  0x17   :  { %2026 = vmatprep.subr.mxu0 %v2231_v0 }
  0x18   :  { %2027 = vmatpush3.msra.mxu0 %v47_v17 }
  0x19   :  { %2028 = vmatprep.subr.mxu0 %v2231_v0 }
  0x1a   :  { %2029 = vmatpush3.msra.mxu0 %v46_v18 }
  0x1b   :  { %2030 = vmatprep.subr.mxu0 %v2231_v0 }
  0x1c   :  { %2031 = vmatpush3.msra.mxu0 %v45_v19 }
  0x1d   :  { %2032 = vmatprep.subr.mxu0 %v2231_v0 }
  0x1e   :  { %2033 = vmatpush3.msra.mxu0 %v44_v20 }
  0x1f   :  { %2034 = vmatprep.subr.mxu0 %v2231_v0 }
  0x20   :  { %2035 = vmatpush3.msra.mxu0 %v43_v21 }
  0x21   :  { %2037 = vmatmul.mubr.f32.vlgmr.msra.gmra.mxu0 %v36_v11  ;;  %2044 = vmatprep.subr.mxu0 %v2231_v0 }
  0x22   :  { %2052 = vmatprep.mubr.msk.f32.mxu0 %vm2232_vm0, %v2231_v0  ;;  %2045 = vmatpush3.msra.mxu0 %v40_v22 }
  0x23   :  { %2046 = vmatprep.subr.mxu0 %v2231_v0 }
  0x24   :  { %2047 = vmatpush3.msra.mxu0 %v39_v23 }
  0x25   :  { %2048 = vmatprep.subr.mxu0 %v2231_v0 }
  0x26   :  { %2049 = vmatpush3.msra.mxu0 %v38_v24 }
  0x27   :  { %2050 = vmatprep.subr.mxu0 %v2231_v0 }
  0x28   :  { %2051 = vmatpush3.msra.mxu0 %v37_v26 }
  0x29   :  { %2090 = vmatprep.subr.mxu0 %v2231_v0 }
  0xcb   :  { %v321_v25 = vpop.f32.mrf.mxu1 }
  0xcd   :  { %v2043_v26 = vpop.f32.mrf.mxu1 }
  0xe1   :  { %v125_v33 = vpop.f32.mrf.mxu0 }
  0xe2   :  { %v130_v34 = vcombine.high %v125_v33, %v125_v33  ;;  %v137_v35 = vrot.slane %v125_v33, %v2382_v32  ;;  %v1836_v33 = vld [vmem:[%s2981_s2 + $0xe0] sm:$0xff] }
  0xe3   :  { %v2038_v37 = vpop.f32.mrf.mxu0  ;;  %2062 = vmatpush3.msra.mxu1 %v1836_v33  ;;  %v1844_v33 = vld [vmem:[%s2985_s3 + $0x60] sm:$0xff] }
  0xe4   :  { %v144_v38 = vrot.slane %v130_v34, %v2382_v32  ;;  %v145_v39 = vcombine.high %v137_v35, %v137_v35  ;;  %v153_v40 = vrot.slane %v137_v35, %v2382_v32  ;;  %2063 = vmatprep.subr.mxu1 %v2231_v0  ;;  %v1835_v34 = vld [vmem:[%s2981_s2 + $0xd8] sm:$0xff]  ;;  %v1834_v35 = vld [vmem:[%s2981_s2 + $0xd0] sm:$0xff]  ;;  %v1833_v37 = vld [vmem:[%s2981_s2 + $0xc8] sm:$0xff] }
  0xe5   :  { %2064 = vmatpush3.msra.mxu1 %v1835_v34 }
  0xe6   :  { %v146_v41 = vcombine.high %v144_v38, %v144_v38  ;;  %v167_v42 = vrot.slane %v145_v39, %v2382_v32  ;;  %v175_v43 = vcombine.high %v153_v40, %v153_v40  ;;  %v160_v45 = vrot.slane %v144_v38, %v2382_v32  ;;  %2065 = vmatprep.subr.mxu1 %v2231_v0  ;;  %v1832_v38 = vld [vmem:[%s2981_s2 + $0xc0] sm:$0xff]  ;;  %v1831_v39 = vld [vmem:[%s2981_s2 + $0xb8] sm:$0xff] }
  0xe7   :  { %v190_v46 = vrot.slane %v153_v40, %v2386_v36  ;;  %2066 = vmatpush3.msra.mxu1 %v1834_v35  ;;  %v1830_v40 = vld [vmem:[%s2981_s2 + $0xb0] sm:$0xff] }
  0xe8   :  { %v174_v47 = vrot.slane %v146_v41, %v2382_v32  ;;  %v177_v48 = vcombine.high %v167_v42, %v167_v42  ;;  %v194_v51 = vrot.slane %v167_v42, %v2386_v36  ;;  %v198_v52 = vrot.slane %v175_v43, %v2386_v36  ;;  %2067 = vmatprep.subr.mxu1 %v2231_v0  ;;  %v1829_v41 = vld [vmem:[%s2981_s2 + $0xa8] sm:$0xff]  ;;  %v1828_v42 = vld [vmem:[%s2981_s2 + $0xa0] sm:$0xff]  ;;  %v1827_v43 = vld [vmem:[%s2981_s2 + $0x98] sm:$0xff] }
  0xe9   :  { %v227_v53 = vmul.f32 %v190_v46, %v179_v44  ;;  %v176_v56 = vcombine.high %v160_v45, %v160_v45  ;;  %v206_v57 = vrot.slane %v160_v45, %v2386_v36  ;;  %2068 = vmatpush3.msra.mxu1 %v1833_v37  ;;  %v1826_v44 = vld [vmem:[%s2981_s2 + $0x90] sm:$0xff]  ;;  %v1825_v45 = vld [vmem:[%s2981_s2 + $0x88] sm:$0xff]  ;;  %v1824_v46 = vld [vmem:[%s2981_s2 + $0x80] sm:$0xff] }
  0xea   :  { %v202_v55 = vrot.slane %v177_v48, %v2386_v36  ;;  %v228_v58 = vmul.f32 %v194_v51, %v180_v49  ;;  %v229_v59 = vmul.f32 %v198_v52, %v181_v50  ;;  %v178_v60 = vcombine.high %v174_v47, %v174_v47  ;;  %2069 = vmatprep.subr.mxu1 %v2231_v0 }
  0xeb   :  { %v210_v62 = vrot.slane %v174_v47, %v2386_v36  ;;  %v236_v1 = vsel %vm235_vm2, %v227_v53, 0.0  ;;  %v214_v5 = vrot.slane %v176_v56, %v2386_v36  ;;  %v231_v6 = vmul.f32 %v206_v57, %v183_v61  ;;  %2070 = vmatpush3.msra.mxu1 %v1832_v38  ;;  %v41_v47 = vld [vmem:[%s2982_s1 + $0x90] sm:$0xff]  ;;  %v413_v61 = vld [vmem:[%s2984_s4 + $0x8] sm:$0xff] }
  0xec   :  { %v230_v63 = vmul.f32 %v202_v55, %v182_v54  ;;  %v237_v2 = vsel %vm235_vm2, %v228_v58, 0.0  ;;  %v239_v7 = vsel %vm235_vm2, %v229_v59, 0.0  ;;  %v218_v10 = vrot.slane %v178_v60, %v2386_v36  ;;  %2071 = vmatprep.subr.mxu1 %v2231_v0 }
  0xed   :  { %v238_v4 = vadd.f32 %v237_v2, %v236_v1  ;;  %v232_v11 = vmul.f32 %v210_v62, %v184_v3  ;;  %v233_v15 = vmul.f32 %v214_v5, %v185_v8  ;;  %v243_v16 = vsel %vm235_vm2, %v231_v6, 0.0  ;;  %2072 = vmatpush3.msra.mxu1 %v1831_v39  ;;  %v411_v62 = vld [vmem:[%s2982_s1 + $0x48] sm:$0xff]  ;;  %v409_v1 = vld [vmem:[%s2982_s1 + $0x38] sm:$0xff]  ;;  %v408_v2 = vld [vmem:[%s2982_s1 + $0x30] sm:$0xff] }
  0xee   :  { %v241_v12 = vsel %vm235_vm2, %v230_v63, 0.0  ;;  %v234_v18 = vmul.f32 %v218_v10, %v186_v13  ;;  %2073 = vmatprep.subr.mxu1 %v2231_v0  ;;  %v410_v63 = vld [vmem:[%s2982_s1 + $0x40] sm:$0xff]  ;;  %v1845_v39 = vld [vmem:[%s2985_s3 + $0x68] sm:$0xff] }
  0xef   :  { %v240_v9 = vadd.f32 %v239_v7, %v238_v4  ;;  %v245_v19 = vsel %vm235_vm2, %v232_v11, 0.0  ;;  %v247_v21 = vsel %vm235_vm2, %v233_v15, 0.0  ;;  %2074 = vmatpush3.msra.mxu1 %v1830_v40  ;;  %v1840_v13 = vld [vmem:[%s2985_s3 + $0x40] sm:$0xff] }
  0xf0   :  { %v249_v23 = vsel %vm235_vm2, %v234_v18, 0.0  ;;  %2075 = vmatprep.subr.mxu1 %v2231_v0  ;;  %v1841_v18 = vld [vmem:[%s2985_s3 + $0x48] sm:$0xff] }
  0xf1   :  { %v242_v14 = vadd.f32 %v241_v12, %v240_v9  ;;  %2076 = vmatpush3.msra.mxu1 %v1829_v41 }
  0xf2   :  { %2077 = vmatprep.subr.mxu1 %v2231_v0 }
  0xf3   :  { %v244_v17 = vadd.f32 %v243_v16, %v242_v14  ;;  %2078 = vmatpush3.msra.mxu1 %v1828_v42 }
  0xf4   :  { %2079 = vmatprep.subr.mxu1 %v2231_v0 }
  0xf5   :  { %v246_v20 = vadd.f32 %v245_v19, %v244_v17  ;;  %2080 = vmatpush3.msra.mxu1 %v1827_v43  ;;  %v1842_v19 = vld [vmem:[%s2985_s3 + $0x50] sm:$0xff] }
  0xf6   :  { %2081 = vmatprep.subr.mxu1 %v2231_v0 }
  0xf7   :  { %v248_v22 = vadd.f32 %v247_v21, %v246_v20  ;;  %2082 = vmatpush3.msra.mxu1 %v1826_v44  ;;  %v1846_v44 = vld [vmem:[%s2985_s3 + $0x70] sm:$0xff] }
  0xf8   :  { %2083 = vmatprep.subr.mxu1 %v2231_v0 }
  0xf9   :  { %v250_v24 = vadd.f32 %v249_v23, %v248_v22  ;;  %2084 = vmatpush3.msra.mxu1 %v1825_v45  ;;  %v1843_v23 = vld [vmem:[%s2985_s3 + $0x58] sm:$0xff] }
  0xfa   :  { %2085 = vmatprep.subr.mxu1 %v2231_v0 }
  0xfb   :  { %2053 = vmatmul.mubr.msk.f32.vlgmr.msra.gmra.mxu0 %vm235_vm2, %v250_v24  ;;  %2086 = vmatpush3.msra.mxu1 %v1824_v46 }
  0xfc   :  { %2092 = vmatprep.mubr.msk.f32.mxu0 %vm2232_vm0, %v2231_v0  ;;  %2106 = vmatprep.subr.mxu1 %v2231_v0 }
 0x1bb   :  { %v394_v48 = vpop.f32.mrf.mxu0 }
 0x1bc   :  { %v395_v49 = vadd.f32 %v394_v48, %v321_v25 }
 0x1bd   :  { %v2054_v50 = vpop.f32.mrf.mxu0 }
 0x1be   :  { %v398_v51 = vadd.f32 %v395_v49, %v41_v47  ;;  %v1847_v49 = vld [vmem:[%s2985_s3 + $0x78] sm:$0xff] }
 0x1c0   :  { %v400_v52 = vmul.f32 %v398_v51, %v398_v51  ;;  %v399_v58 = vmul.f32 0.5, %v398_v51 }
 0x1c2   :  { %v401_v53 = vmul.f32 %v400_v52, %v398_v51 }
 0x1c4   :  { %v402_v54 = vmul.f32 0.044715, %v401_v53 }
 0x1c6   :  { %v403_v55 = vadd.f32 %v402_v54, %v398_v51 }
 0x1c8   :  { %v404_v56 = vmul.f32 0.7978846, %v403_v55 }
 0x1ca   :  { %2221 = vtanh.f32 %v404_v56 }
 0x1d7   :  { %v2222_v57 = vpop.eup %2221 }
 0x1d8   :  { %v406_v59 = vadd.f32 1.0, %v2222_v57 }
 0x1da   :  { %v407_v60 = vmul.f32 %v406_v59, %v399_v58 }
 0x1dc   :  { %2088 = vmatmul.mubr.f32.vlgmr.msra.gmra.mxu1 %v407_v60  ;;  %2091 = vmatpush3.msra.mxu0 %v407_v60 }
 0x1dd   :  { %2095 = vmatprep.subr.mxu0 %v2231_v0  ;;  %2138 = vmatprep.mubr.msk.f32.mxu1 %vm2232_vm0, %v2231_v0 }
 0x1de   :  { %2093 = vmatmul.mubr.msk.f32.vlgmr.msra.gmra.mxu0 %vm251_vm1, %v413_v61 }
 0x1df   :  { %2103 = vmatprep.mubr.msk.f32.mxu0 %vm2232_vm0, %v2231_v0  ;;  %2096 = vmatpush3.msra.mxu0 %v411_v62 }
 0x1e0   :  { %2097 = vmatprep.subr.mxu0 %v2231_v0 }
 0x1e1   :  { %2098 = vmatpush3.msra.mxu0 %v410_v63  ;;  %v1865_v63 = vld [vmem:[%s2981_s2 + $0x178] sm:$0xff] }
 0x1e2   :  { %2099 = vmatprep.subr.mxu0 %v2231_v0  ;;  %2107 = vmatpush3.msra.mxu1 %v1865_v63 }
 0x1e3   :  { %2100 = vmatpush3.msra.mxu0 %v409_v1  ;;  %2108 = vmatprep.subr.mxu1 %v2231_v0  ;;  %v1864_v1 = vld [vmem:[%s2981_s2 + $0x170] sm:$0xff] }
 0x1e4   :  { %2101 = vmatprep.subr.mxu0 %v2231_v0  ;;  %2109 = vmatpush3.msra.mxu1 %v1864_v1 }
 0x1e5   :  { %2102 = vmatpush3.msra.mxu0 %v408_v2  ;;  %2110 = vmatprep.subr.mxu1 %v2231_v0  ;;  %v1863_v2 = vld [vmem:[%s2981_s2 + $0x168] sm:$0xff] }
 0x1e6   :  { %2141 = vmatprep.subr.mxu0 %v2231_v0  ;;  %2111 = vmatpush3.msra.mxu1 %v1863_v2 }
 0x1e7   :  { %2112 = vmatprep.subr.mxu1 %v2231_v0 }
 0x29c   :  { %v497_v3 = vpop.f32.mrf.mxu1 }
 0x29d   :  { %v502_v4 = vcombine.high %v497_v3, %v497_v3  ;;  %v509_v5 = vrot.slane %v497_v3, %v2382_v32  ;;  %v1862_v3 = vld [vmem:[%s2981_s2 + $0x160] sm:$0xff] }
 0x29e   :  { %v2089_v6 = vpop.f32.mrf.mxu1  ;;  %v692_v61 = vpop.f32.mrf.mxu0  ;;  %2113 = vmatpush3.msra.mxu1 %v1862_v3  ;;  %v1870_v3 = vld [vmem:[%s2985_s3 + $0xa0] sm:$0xff] }
 0x29f   :  { %v516_v7 = vrot.slane %v502_v4, %v2382_v32  ;;  %v517_v8 = vcombine.high %v509_v5, %v509_v5  ;;  %v525_v9 = vrot.slane %v509_v5, %v2382_v32  ;;  %2114 = vmatprep.subr.mxu1 %v2231_v0  ;;  %v1861_v4 = vld [vmem:[%s2981_s2 + $0x158] sm:$0xff]  ;;  %v1860_v5 = vld [vmem:[%s2981_s2 + $0x150] sm:$0xff]  ;;  %v1859_v6 = vld [vmem:[%s2981_s2 + $0x148] sm:$0xff] }
 0x2a0   :  { %v2094_v62 = vpop.f32.mrf.mxu0  ;;  %2115 = vmatpush3.msra.mxu1 %v1861_v4 }
 0x2a1   :  { %v518_v10 = vcombine.high %v516_v7, %v516_v7  ;;  %v539_v11 = vrot.slane %v517_v8, %v2382_v32  ;;  %v547_v12 = vcombine.high %v525_v9, %v525_v9  ;;  %v532_v14 = vrot.slane %v516_v7, %v2382_v32  ;;  %2116 = vmatprep.subr.mxu1 %v2231_v0  ;;  %v1858_v7 = vld [vmem:[%s2981_s2 + $0x140] sm:$0xff]  ;;  %v1857_v8 = vld [vmem:[%s2981_s2 + $0x138] sm:$0xff] }
 0x2a2   :  { %v563_v15 = vrot.slane %v525_v9, %v2386_v36  ;;  %2117 = vmatpush3.msra.mxu1 %v1860_v5  ;;  %v1856_v9 = vld [vmem:[%s2981_s2 + $0x130] sm:$0xff] }
 0x2a3   :  { %v546_v16 = vrot.slane %v518_v10, %v2382_v32  ;;  %v549_v17 = vcombine.high %v539_v11, %v539_v11  ;;  %v567_v20 = vrot.slane %v539_v11, %v2386_v36  ;;  %v571_v21 = vrot.slane %v547_v12, %v2386_v36  ;;  %2118 = vmatprep.subr.mxu1 %v2231_v0  ;;  %v1855_v10 = vld [vmem:[%s2981_s2 + $0x128] sm:$0xff]  ;;  %v1854_v11 = vld [vmem:[%s2981_s2 + $0x120] sm:$0xff]  ;;  %v1853_v12 = vld [vmem:[%s2981_s2 + $0x118] sm:$0xff] }
 0x2a4   :  { %v600_v22 = vmul.f32 %v1840_v13, %v563_v15  ;;  %v548_v25 = vcombine.high %v532_v14, %v532_v14  ;;  %v579_v26 = vrot.slane %v532_v14, %v2386_v36  ;;  %2119 = vmatpush3.msra.mxu1 %v1859_v6  ;;  %v1852_v13 = vld [vmem:[%s2981_s2 + $0x110] sm:$0xff]  ;;  %v1851_v14 = vld [vmem:[%s2981_s2 + $0x108] sm:$0xff]  ;;  %v1850_v15 = vld [vmem:[%s2981_s2 + $0x100] sm:$0xff] }
 0x2a5   :  { %v575_v24 = vrot.slane %v549_v17, %v2386_v36  ;;  %v601_v27 = vmul.f32 %v1841_v18, %v567_v20  ;;  %v602_v28 = vmul.f32 %v1842_v19, %v571_v21  ;;  %v550_v30 = vcombine.high %v546_v16, %v546_v16  ;;  %2120 = vmatprep.subr.mxu1 %v2231_v0 }
 0x2a6   :  { %v583_v34 = vrot.slane %v546_v16, %v2386_v36  ;;  %v608_v37 = vsel %vm235_vm2, %v600_v22, 0.0  ;;  %v587_v41 = vrot.slane %v548_v25, %v2386_v36  ;;  %v604_v42 = vmul.f32 %v1844_v33, %v579_v26  ;;  %2121 = vmatpush3.msra.mxu1 %v1858_v7  ;;  %v412_v16 = vld [vmem:[%s2982_s1 + $0x98] sm:$0xff]  ;;  %v784_v33 = vld [vmem:[%s2984_s4 + $0x10] sm:$0xff] }
 0x2a7   :  { %v603_v35 = vmul.f32 %v1843_v23, %v575_v24  ;;  %v609_v38 = vsel %vm235_vm2, %v601_v27, 0.0  ;;  %v611_v43 = vsel %vm235_vm2, %v602_v28, 0.0  ;;  %v591_v46 = vrot.slane %v550_v30, %v2386_v36  ;;  %2122 = vmatprep.subr.mxu1 %v2231_v0 }
 0x2a8   :  { %v610_v40 = vadd.f32 %v609_v38, %v608_v37  ;;  %v605_v47 = vmul.f32 %v1845_v39, %v583_v34  ;;  %v606_v51 = vmul.f32 %v1846_v44, %v587_v41  ;;  %v615_v52 = vsel %vm235_vm2, %v604_v42, 0.0  ;;  %2123 = vmatpush3.msra.mxu1 %v1857_v8  ;;  %v782_v34 = vld [vmem:[%s2982_s1 + $0x68] sm:$0xff]  ;;  %v780_v37 = vld [vmem:[%s2982_s1 + $0x58] sm:$0xff]  ;;  %v779_v38 = vld [vmem:[%s2982_s1 + $0x50] sm:$0xff] }
 0x2a9   :  { %v613_v48 = vsel %vm235_vm2, %v603_v35, 0.0  ;;  %v607_v54 = vmul.f32 %v1847_v49, %v591_v46  ;;  %2124 = vmatprep.subr.mxu1 %v2231_v0  ;;  %v781_v35 = vld [vmem:[%s2982_s1 + $0x60] sm:$0xff]  ;;  %v1871_v8 = vld [vmem:[%s2985_s3 + $0xa8] sm:$0xff] }
 0x2aa   :  { %v612_v45 = vadd.f32 %v611_v43, %v610_v40  ;;  %v617_v55 = vsel %vm235_vm2, %v605_v47, 0.0  ;;  %v619_v57 = vsel %vm235_vm2, %v606_v51, 0.0  ;;  %2125 = vmatpush3.msra.mxu1 %v1856_v9  ;;  %v1866_v49 = vld [vmem:[%s2985_s3 + $0x80] sm:$0xff] }
 0x2ab   :  { %v621_v59 = vsel %vm235_vm2, %v607_v54, 0.0  ;;  %2126 = vmatprep.subr.mxu1 %v2231_v0  ;;  %v1867_v54 = vld [vmem:[%s2985_s3 + $0x88] sm:$0xff] }
 0x2ac   :  { %v614_v50 = vadd.f32 %v613_v48, %v612_v45  ;;  %2127 = vmatpush3.msra.mxu1 %v1855_v10 }
 0x2ad   :  { %2128 = vmatprep.subr.mxu1 %v2231_v0 }
 0x2ae   :  { %v616_v53 = vadd.f32 %v615_v52, %v614_v50  ;;  %2129 = vmatpush3.msra.mxu1 %v1854_v11 }
 0x2af   :  { %2130 = vmatprep.subr.mxu1 %v2231_v0 }
 0x2b0   :  { %v618_v56 = vadd.f32 %v617_v55, %v616_v53  ;;  %2131 = vmatpush3.msra.mxu1 %v1853_v12  ;;  %v1868_v55 = vld [vmem:[%s2985_s3 + $0x90] sm:$0xff] }
 0x2b1   :  { %2132 = vmatprep.subr.mxu1 %v2231_v0 }
 0x2b2   :  { %v620_v58 = vadd.f32 %v619_v57, %v618_v56  ;;  %2133 = vmatpush3.msra.mxu1 %v1852_v13  ;;  %v1872_v13 = vld [vmem:[%s2985_s3 + $0xb0] sm:$0xff] }
 0x2b3   :  { %2134 = vmatprep.subr.mxu1 %v2231_v0 }
 0x2b4   :  { %v622_v60 = vadd.f32 %v621_v59, %v620_v58  ;;  %2135 = vmatpush3.msra.mxu1 %v1851_v14  ;;  %v1869_v59 = vld [vmem:[%s2985_s3 + $0x98] sm:$0xff] }
 0x2b5   :  { %2136 = vmatprep.subr.mxu1 %v2231_v0 }
 0x2b6   :  { %2104 = vmatmul.mubr.msk.f32.vlgmr.msra.gmra.mxu0 %vm235_vm2, %v622_v60  ;;  %2137 = vmatpush3.msra.mxu1 %v1850_v15 }
 0x2b7   :  { %2143 = vmatprep.mubr.msk.f32.mxu0 %vm2232_vm0, %v2231_v0  ;;  %2192 = vmatprep.subr.mxu1 %v2231_v0 }
 0x376   :  { %v765_v17 = vpop.f32.mrf.mxu0 }
 0x377   :  { %v766_v18 = vadd.f32 %v765_v17, %v692_v61 }
 0x378   :  { %v2105_v19 = vpop.f32.mrf.mxu0 }
 0x379   :  { %v769_v20 = vadd.f32 %v766_v18, %v412_v16  ;;  %v1873_v18 = vld [vmem:[%s2985_s3 + $0xb8] sm:$0xff] }
 0x37b   :  { %v771_v21 = vmul.f32 %v769_v20, %v769_v20  ;;  %v770_v27 = vmul.f32 0.5, %v769_v20 }
 0x37d   :  { %v772_v22 = vmul.f32 %v771_v21, %v769_v20 }
 0x37f   :  { %v773_v23 = vmul.f32 0.044715, %v772_v22 }
 0x381   :  { %v774_v24 = vadd.f32 %v773_v23, %v769_v20 }
 0x383   :  { %v775_v25 = vmul.f32 0.7978846, %v774_v24 }
 0x385   :  { %2223 = vtanh.f32 %v775_v25 }
 0x392   :  { %v2224_v26 = vpop.eup %2223 }
 0x393   :  { %v777_v28 = vadd.f32 1.0, %v2224_v26 }
 0x395   :  { %v778_v30 = vmul.f32 %v777_v28, %v770_v27 }
 0x397   :  { %2139 = vmatmul.mubr.f32.vlgmr.msra.gmra.mxu1 %v778_v30  ;;  %2142 = vmatpush3.msra.mxu0 %v778_v30 }
 0x398   :  { %2146 = vmatprep.subr.mxu0 %v2231_v0  ;;  %2194 = vmatprep.mubr.msk.f32.mxu1 %vm2232_vm0, %v2231_v0 }
 0x399   :  { %2144 = vmatmul.mubr.msk.f32.vlgmr.msra.gmra.mxu0 %vm251_vm1, %v784_v33 }
 0x39a   :  { %2154 = vmatprep.mubr.msk.f32.mxu0 %vm2232_vm0, %v2231_v0  ;;  %2147 = vmatpush3.msra.mxu0 %v782_v34 }
 0x39b   :  { %2148 = vmatprep.subr.mxu0 %v2231_v0 }
 0x39c   :  { %2149 = vmatpush3.msra.mxu0 %v781_v35  ;;  %v1891_v35 = vld [vmem:[%s2981_s2 + $0x1f8] sm:$0xff] }
 0x39d   :  { %2150 = vmatprep.subr.mxu0 %v2231_v0 }
 0x39e   :  { %2151 = vmatpush3.msra.mxu0 %v780_v37  ;;  %v1890_v37 = vld [vmem:[%s2981_s2 + $0x1f0] sm:$0xff] }
 0x39f   :  { %2152 = vmatprep.subr.mxu0 %v2231_v0 }
 0x3a0   :  { %2153 = vmatpush3.msra.mxu0 %v779_v38  ;;  %v1889_v38 = vld [vmem:[%s2981_s2 + $0x1e8] sm:$0xff] }
 0x3a1   :  { %2157 = vmatprep.subr.mxu0 %v2231_v0 }
 0x457   :  { %v868_v39 = vpop.f32.mrf.mxu1 }
 0x458   :  { %v873_v40 = vcombine.high %v868_v39, %v868_v39  ;;  %v880_v41 = vrot.slane %v868_v39, %v2382_v32  ;;  %v1888_v39 = vld [vmem:[%s2981_s2 + $0x1e0] sm:$0xff] }
 0x459   :  { %v2140_v42 = vpop.f32.mrf.mxu1  ;;  %v1063_v33 = vpop.f32.mrf.mxu0 }
 0x45a   :  { %v887_v43 = vrot.slane %v873_v40, %v2382_v32  ;;  %v888_v44 = vcombine.high %v880_v41, %v880_v41  ;;  %v896_v45 = vrot.slane %v880_v41, %v2382_v32  ;;  %v1887_v40 = vld [vmem:[%s2981_s2 + $0x1d8] sm:$0xff]  ;;  %v1886_v41 = vld [vmem:[%s2981_s2 + $0x1d0] sm:$0xff]  ;;  %v1885_v42 = vld [vmem:[%s2981_s2 + $0x1c8] sm:$0xff] }
 0x45b   :  { %v2145_v34 = vpop.f32.mrf.mxu0 }
 0x45c   :  { %v889_v46 = vcombine.high %v887_v43, %v887_v43  ;;  %v910_v47 = vrot.slane %v888_v44, %v2382_v32  ;;  %v918_v48 = vcombine.high %v896_v45, %v896_v45  ;;  %v903_v50 = vrot.slane %v887_v43, %v2382_v32  ;;  %v1884_v43 = vld [vmem:[%s2981_s2 + $0x1c0] sm:$0xff]  ;;  %v1883_v44 = vld [vmem:[%s2981_s2 + $0x1b8] sm:$0xff] }
 0x45d   :  { %v934_v51 = vrot.slane %v896_v45, %v2386_v36  ;;  %v1882_v45 = vld [vmem:[%s2981_s2 + $0x1b0] sm:$0xff] }
 0x45e   :  { %v917_v52 = vrot.slane %v889_v46, %v2382_v32  ;;  %v920_v53 = vcombine.high %v910_v47, %v910_v47  ;;  %v938_v56 = vrot.slane %v910_v47, %v2386_v36  ;;  %v942_v57 = vrot.slane %v918_v48, %v2386_v36  ;;  %v1881_v46 = vld [vmem:[%s2981_s2 + $0x1a8] sm:$0xff]  ;;  %v1880_v47 = vld [vmem:[%s2981_s2 + $0x1a0] sm:$0xff]  ;;  %v1879_v48 = vld [vmem:[%s2981_s2 + $0x198] sm:$0xff] }
 0x45f   :  { %v971_v58 = vmul.f32 %v1866_v49, %v934_v51  ;;  %v919_v61 = vcombine.high %v903_v50, %v903_v50  ;;  %v950_v62 = vrot.slane %v903_v50, %v2386_v36  ;;  %v1878_v49 = vld [vmem:[%s2981_s2 + $0x190] sm:$0xff]  ;;  %v1877_v50 = vld [vmem:[%s2981_s2 + $0x188] sm:$0xff]  ;;  %v1876_v51 = vld [vmem:[%s2981_s2 + $0x180] sm:$0xff] }
 0x460   :  { %v946_v60 = vrot.slane %v920_v53, %v2386_v36  ;;  %v972_v63 = vmul.f32 %v1867_v54, %v938_v56  ;;  %v973_v1 = vmul.f32 %v1868_v55, %v942_v57  ;;  %v921_v2 = vcombine.high %v917_v52, %v917_v52 }
 0x461   :  { %v954_v4 = vrot.slane %v917_v52, %v2386_v36  ;;  %v979_v6 = vsel %vm235_vm2, %v971_v58, 0.0  ;;  %v958_v10 = vrot.slane %v919_v61, %v2386_v36  ;;  %v975_v11 = vmul.f32 %v1870_v3, %v950_v62  ;;  %v783_v52 = vld [vmem:[%s2982_s1 + $0xa0] sm:$0xff]  ;;  %v1153_v3 = vld [vmem:[%s2982_s1 + $0x88] sm:$0xff] }
 0x462   :  { %v974_v5 = vmul.f32 %v1869_v59, %v946_v60  ;;  %v980_v7 = vsel %vm235_vm2, %v972_v63, 0.0  ;;  %v982_v12 = vsel %vm235_vm2, %v973_v1, 0.0  ;;  %v962_v15 = vrot.slane %v921_v2, %v2386_v36 }
 0x463   :  { %v981_v9 = vadd.f32 %v980_v7, %v979_v6  ;;  %v976_v16 = vmul.f32 %v1871_v8, %v954_v4  ;;  %v977_v20 = vmul.f32 %v1872_v13, %v958_v10  ;;  %v986_v21 = vsel %vm235_vm2, %v975_v11, 0.0  ;;  %v1152_v4 = vld [vmem:[%s2982_s1 + $0x80] sm:$0xff]  ;;  %v1155_v6 = vld [vmem:[%s2984_s4 + $0x18] sm:$0xff]  ;;  %v1150_v7 = vld [vmem:[%s2982_s1 + $0x70] sm:$0xff] }
 0x464   :  { %v984_v17 = vsel %vm235_vm2, %v974_v5, 0.0  ;;  %v978_v23 = vmul.f32 %v1873_v18, %v962_v15  ;;  %v1151_v5 = vld [vmem:[%s2982_s1 + $0x78] sm:$0xff]  ;;  %v1892_v18 = vld [vmem:[%s2985_s3 + $0xc0] sm:$0xff] }
 0x465   :  { %v983_v14 = vadd.f32 %v982_v12, %v981_v9  ;;  %v988_v24 = vsel %vm235_vm2, %v976_v16, 0.0  ;;  %v990_v26 = vsel %vm235_vm2, %v977_v20, 0.0 }
 0x466   :  { %v992_v28 = vsel %vm235_vm2, %v978_v23, 0.0  ;;  %v1893_v23 = vld [vmem:[%s2985_s3 + $0xc8] sm:$0xff] }
 0x467   :  { %v985_v19 = vadd.f32 %v984_v17, %v983_v14 }
 0x469   :  { %v987_v22 = vadd.f32 %v986_v21, %v985_v19 }
 0x46b   :  { %v989_v25 = vadd.f32 %v988_v24, %v987_v22  ;;  %v1894_v24 = vld [vmem:[%s2985_s3 + $0xd0] sm:$0xff] }
 0x46d   :  { %v991_v27 = vadd.f32 %v990_v26, %v989_v25 }
 0x46f   :  { %v993_v30 = vadd.f32 %v992_v28, %v991_v27  ;;  %v1895_v28 = vld [vmem:[%s2985_s3 + $0xd8] sm:$0xff] }
 0x471   :  { %2155 = vmatmul.mubr.msk.f32.vlgmr.msra.gmra.mxu0 %vm235_vm2, %v993_v30 }
 0x472   :  { %2189 = vmatprep.mubr.msk.f32.mxu0 %vm2232_vm0, %v2231_v0  ;;  %2158 = vmatpush3.msra.mxu0 %v1891_v35 }
 0x473   :  { %2159 = vmatprep.subr.mxu0 %v2231_v0 }
 0x474   :  { %2160 = vmatpush3.msra.mxu0 %v1890_v37 }
 0x475   :  { %2161 = vmatprep.subr.mxu0 %v2231_v0 }
 0x476   :  { %2162 = vmatpush3.msra.mxu0 %v1889_v38 }
 0x477   :  { %2163 = vmatprep.subr.mxu0 %v2231_v0 }
 0x478   :  { %2164 = vmatpush3.msra.mxu0 %v1888_v39  ;;  %v1896_v39 = vld [vmem:[%s2985_s3 + $0xe0] sm:$0xff] }
 0x479   :  { %2165 = vmatprep.subr.mxu0 %v2231_v0 }
 0x47a   :  { %2166 = vmatpush3.msra.mxu0 %v1887_v40 }
 0x47b   :  { %2167 = vmatprep.subr.mxu0 %v2231_v0 }
 0x47c   :  { %2168 = vmatpush3.msra.mxu0 %v1886_v41 }
 0x47d   :  { %2169 = vmatprep.subr.mxu0 %v2231_v0 }
 0x47e   :  { %2170 = vmatpush3.msra.mxu0 %v1885_v42 }
 0x47f   :  { %2171 = vmatprep.subr.mxu0 %v2231_v0 }
 0x480   :  { %2172 = vmatpush3.msra.mxu0 %v1884_v43 }
 0x481   :  { %2173 = vmatprep.subr.mxu0 %v2231_v0 }
 0x482   :  { %2174 = vmatpush3.msra.mxu0 %v1883_v44  ;;  %v1897_v44 = vld [vmem:[%s2985_s3 + $0xe8] sm:$0xff] }
 0x483   :  { %2175 = vmatprep.subr.mxu0 %v2231_v0 }
 0x484   :  { %2176 = vmatpush3.msra.mxu0 %v1882_v45 }
 0x485   :  { %2177 = vmatprep.subr.mxu0 %v2231_v0 }
 0x486   :  { %2178 = vmatpush3.msra.mxu0 %v1881_v46 }
 0x487   :  { %2179 = vmatprep.subr.mxu0 %v2231_v0 }
 0x488   :  { %2180 = vmatpush3.msra.mxu0 %v1880_v47 }
 0x489   :  { %2181 = vmatprep.subr.mxu0 %v2231_v0 }
 0x48a   :  { %2182 = vmatpush3.msra.mxu0 %v1879_v48 }
 0x48b   :  { %2183 = vmatprep.subr.mxu0 %v2231_v0 }
 0x48c   :  { %2184 = vmatpush3.msra.mxu0 %v1878_v49  ;;  %v1898_v49 = vld [vmem:[%s2985_s3 + $0xf0] sm:$0xff] }
 0x48d   :  { %2185 = vmatprep.subr.mxu0 %v2231_v0 }
 0x48e   :  { %2186 = vmatpush3.msra.mxu0 %v1877_v50 }
 0x48f   :  { %2187 = vmatprep.subr.mxu0 %v2231_v0 }
 0x490   :  { %2188 = vmatpush3.msra.mxu0 %v1876_v51 }
 0x491   :  { %2197 = vmatprep.subr.mxu0 %v2231_v0 }
 0x531   :  { %v1136_v53 = vpop.f32.mrf.mxu0 }
 0x532   :  { %v1137_v54 = vadd.f32 %v1136_v53, %v1063_v33 }
 0x533   :  { %v2156_v55 = vpop.f32.mrf.mxu0 }
 0x534   :  { %v1140_v56 = vadd.f32 %v1137_v54, %v783_v52  ;;  %v1899_v54 = vld [vmem:[%s2985_s3 + $0xf8] sm:$0xff] }
 0x536   :  { %v1142_v57 = vmul.f32 %v1140_v56, %v1140_v56  ;;  %v1141_v63 = vmul.f32 0.5, %v1140_v56 }
 0x538   :  { %v1143_v58 = vmul.f32 %v1142_v57, %v1140_v56 }
 0x53a   :  { %v1144_v59 = vmul.f32 0.044715, %v1143_v58 }
 0x53c   :  { %v1145_v60 = vadd.f32 %v1144_v59, %v1140_v56 }
 0x53e   :  { %v1146_v61 = vmul.f32 0.7978846, %v1145_v60 }
 0x540   :  { %2225 = vtanh.f32 %v1146_v61 }
 0x54d   :  { %v2226_v62 = vpop.eup %2225 }
 0x54e   :  { %v1148_v1 = vadd.f32 1.0, %v2226_v62 }
 0x550   :  { %v1149_v2 = vmul.f32 %v1148_v1, %v1141_v63 }
 0x552   :  { %2190 = vmatmul.mubr.f32.vlgmr.msra.gmra.mxu0 %v1149_v2  ;;  %2193 = vmatpush3.msra.mxu1 %v1149_v2 }
 0x553   :  { %2205 = vmatprep.mubr.msk.f32.mxu0 %vm2232_vm0, %v2231_v0  ;;  %2208 = vmatprep.subr.mxu1 %v2231_v0 }
 0x554   :  { %2198 = vmatpush3.msra.mxu0 %v1153_v3  ;;  %2195 = vmatmul.mubr.msk.f32.vlgmr.msra.gmra.mxu1 %vm251_vm1, %v1155_v6 }
 0x555   :  { %2199 = vmatprep.subr.mxu0 %v2231_v0  ;;  %2210 = vmatprep.mubr.msk.f32.mxu1 %vm2232_vm0, %v2231_v0 }
 0x556   :  { %2200 = vmatpush3.msra.mxu0 %v1152_v4 }
 0x557   :  { %2201 = vmatprep.subr.mxu0 %v2231_v0 }
 0x558   :  { %2202 = vmatpush3.msra.mxu0 %v1151_v5  ;;  %v1154_v5 = vld [vmem:[%s2982_s1 + $0xa8] sm:$0xff] }
 0x559   :  { %2203 = vmatprep.subr.mxu0 %v2231_v0 }
 0x55a   :  { %2204 = vmatpush3.msra.mxu0 %v1150_v7 }
 0x55b   :  { %2213 = vmatprep.subr.mxu0 %v2231_v0 }
 0x612   :  { %v1239_v8 = vpop.f32.mrf.mxu0 }
 0x613   :  { %v1244_v9 = vcombine.high %v1239_v8, %v1239_v8  ;;  %v1251_v10 = vrot.slane %v1239_v8, %v2382_v32 }
 0x614   :  { %v2191_v11 = vpop.f32.mrf.mxu0  ;;  %v1434_v3 = vpop.f32.mrf.mxu1 }
 0x615   :  { %v1258_v12 = vrot.slane %v1244_v9, %v2382_v32  ;;  %v1259_v13 = vcombine.high %v1251_v10, %v1251_v10  ;;  %v1267_v14 = vrot.slane %v1251_v10, %v2382_v32 }
 0x616   :  { %v2196_v4 = vpop.f32.mrf.mxu1 }
 0x617   :  { %v1260_v15 = vcombine.high %v1258_v12, %v1258_v12  ;;  %v1281_v16 = vrot.slane %v1259_v13, %v2382_v32  ;;  %v1289_v17 = vcombine.high %v1267_v14, %v1267_v14  ;;  %v1274_v19 = vrot.slane %v1258_v12, %v2382_v32  ;;  %v1523_v4 = vld [vmem:[%s2984_s4 + $0x28] sm:$0x1] }
 0x618   :  { %v1305_v20 = vrot.slane %v1267_v14, %v2386_v36 }
 0x619   :  { %v1288_v21 = vrot.slane %v1260_v15, %v2382_v32  ;;  %v1291_v22 = vcombine.high %v1281_v16, %v1281_v16  ;;  %v1309_v25 = vrot.slane %v1281_v16, %v2386_v36  ;;  %v1313_v26 = vrot.slane %v1289_v17, %v2386_v36 }
 0x61a   :  { %v1342_v27 = vmul.f32 %v1892_v18, %v1305_v20  ;;  %v1290_v33 = vcombine.high %v1274_v19, %v1274_v19  ;;  %v1321_v34 = vrot.slane %v1274_v19, %v2386_v36  ;;  %v1521_v19 = vld [vmem:[%s2984_s4 + $0x20] sm:$0xff]  ;;  %v1710_v20 = vld [vmem:[%s2986_s5 + $0xf8] sm:$0xff] }
 0x61b   :  { %v1317_v30 = vrot.slane %v1291_v22, %v2386_v36  ;;  %v1343_v35 = vmul.f32 %v1893_v23, %v1309_v25  ;;  %v1344_v37 = vmul.f32 %v1894_v24, %v1313_v26  ;;  %v1292_v38 = vcombine.high %v1288_v21, %v1288_v21  ;;  %v1708_v22 = vld [vmem:[%s2986_s5 + $0xe8] sm:$0xff]  ;;  %v1707_v23 = vld [vmem:[%s2986_s5 + $0xe0] sm:$0xff]  ;;  %v1705_v24 = vld [vmem:[%s2986_s5 + $0xd0] sm:$0xff] }
 0x61c   :  { %v1325_v40 = vrot.slane %v1288_v21, %v2386_v36  ;;  %v1350_v42 = vsel %vm235_vm2, %v1342_v27, 0.0  ;;  %v1329_v46 = vrot.slane %v1290_v33, %v2386_v36  ;;  %v1346_v47 = vmul.f32 %v1896_v39, %v1321_v34  ;;  %v1709_v21 = vld [vmem:[%s2986_s5 + $0xf0] sm:$0xff]  ;;  %v1704_v25 = vld [vmem:[%s2986_s5 + $0xc8] sm:$0xff]  ;;  %v1703_v26 = vld [vmem:[%s2986_s5 + $0xc0] sm:$0xff] }
 0x61d   :  { %v1345_v41 = vmul.f32 %v1895_v28, %v1317_v30  ;;  %v1351_v43 = vsel %vm235_vm2, %v1343_v35, 0.0  ;;  %v1353_v48 = vsel %vm235_vm2, %v1344_v37, 0.0  ;;  %v1333_v51 = vrot.slane %v1292_v38, %v2386_v36  ;;  %v1702_v27 = vld [vmem:[%s2986_s5 + $0xb8] sm:$0xff]  ;;  %v1701_v28 = vld [vmem:[%s2986_s5 + $0xb0] sm:$0xff]  ;;  %v1700_v30 = vld [vmem:[%s2986_s5 + $0xa8] sm:$0xff] }
 0x61e   :  { %v1352_v45 = vadd.f32 %v1351_v43, %v1350_v42  ;;  %v1347_v52 = vmul.f32 %v1897_v44, %v1325_v40  ;;  %v1348_v56 = vmul.f32 %v1898_v49, %v1329_v46  ;;  %v1357_v57 = vsel %vm235_vm2, %v1346_v47, 0.0  ;;  %v1699_v33 = vld [vmem:[%s2986_s5 + $0xa0] sm:$0xff]  ;;  %v1698_v34 = vld [vmem:[%s2986_s5 + $0x98] sm:$0xff]  ;;  %v1697_v35 = vld [vmem:[%s2986_s5 + $0x90] sm:$0xff] }
 0x61f   :  { %v1355_v53 = vsel %vm235_vm2, %v1345_v41, 0.0  ;;  %v1349_v59 = vmul.f32 %v1899_v54, %v1333_v51  ;;  %v1696_v37 = vld [vmem:[%s2986_s5 + $0x88] sm:$0xff]  ;;  %v1695_v38 = vld [vmem:[%s2986_s5 + $0x80] sm:$0xff]  ;;  %v1694_v39 = vld [vmem:[%s2986_s5 + $0x78] sm:$0xff] }
 0x620   :  { %v1354_v50 = vadd.f32 %v1353_v48, %v1352_v45  ;;  %v1359_v60 = vsel %vm235_vm2, %v1347_v52, 0.0  ;;  %v1361_v62 = vsel %vm235_vm2, %v1348_v56, 0.0  ;;  %v1693_v40 = vld [vmem:[%s2986_s5 + $0x70] sm:$0xff]  ;;  %v1692_v41 = vld [vmem:[%s2986_s5 + $0x68] sm:$0xff]  ;;  %v1691_v42 = vld [vmem:[%s2986_s5 + $0x60] sm:$0xff] }
 0x621   :  { %v1363_v1 = vsel %vm235_vm2, %v1349_v59, 0.0  ;;  %v1690_v43 = vld [vmem:[%s2986_s5 + $0x58] sm:$0xff]  ;;  %v1689_v44 = vld [vmem:[%s2986_s5 + $0x50] sm:$0xff]  ;;  %v1688_v45 = vld [vmem:[%s2986_s5 + $0x48] sm:$0xff] }
 0x622   :  { %v1356_v55 = vadd.f32 %v1355_v53, %v1354_v50  ;;  %v1687_v46 = vld [vmem:[%s2986_s5 + $0x40] sm:$0xff]  ;;  %v1686_v47 = vld [vmem:[%s2986_s5 + $0x38] sm:$0xff]  ;;  %v1685_v48 = vld [vmem:[%s2986_s5 + $0x30] sm:$0xff] }
 0x623   :  { %v1684_v49 = vld [vmem:[%s2986_s5 + $0x28] sm:$0xff]  ;;  %v1683_v50 = vld [vmem:[%s2986_s5 + $0x20] sm:$0xff]  ;;  %v1682_v51 = vld [vmem:[%s2986_s5 + $0x18] sm:$0xff] }
 0x624   :  { %v1358_v58 = vadd.f32 %v1357_v57, %v1356_v55  ;;  %v1681_v52 = vld [vmem:[%s2986_s5 + $0x10] sm:$0xff]  ;;  %v1680_v53 = vld [vmem:[%s2986_s5 + $0x8] sm:$0xff] }
 0x625   :  { %v1522_v54 = vld [vmem:[%s2982_s1 + $0xb0] sm:$0xff] }
 0x626   :  { %v1360_v61 = vadd.f32 %v1359_v60, %v1358_v58 }
 0x628   :  { %v1362_v63 = vadd.f32 %v1361_v62, %v1360_v61 }
 0x62a   :  { %v1364_v2 = vadd.f32 %v1363_v1, %v1362_v63 }
 0x62c   :  { %2206 = vmatmul.mubr.msk.f32.vlgmr.msra.gmra.mxu0 %vm235_vm2, %v1364_v2 }
 0x62d   :  { %2215 = vmatprep.mubr.msk.f32.mxu0 %vm2232_vm0, %v2231_v0 }
 0x6ec   :  { %v1507_v6 = vpop.f32.mrf.mxu0 }
 0x6ed   :  { %v1508_v7 = vadd.f32 %v1507_v6, %v1434_v3 }
 0x6ee   :  { %v2207_v8 = vpop.f32.mrf.mxu0 }
 0x6ef   :  { %v1511_v9 = vadd.f32 %v1508_v7, %v1154_v5  ;;  %v1679_v5 = vld [vmem:[%s2986_s5] sm:$0xff]  ;;  %v1719_v8 = vsub.s32 1, %v2379_v31 }
 0x6f1   :  { %v1513_v10 = vmul.f32 %v1511_v9, %v1511_v9  ;;  %v1512_v16 = vmul.f32 0.5, %v1511_v9 }
 0x6f3   :  { %v1514_v11 = vmul.f32 %v1513_v10, %v1511_v9 }
 0x6f5   :  { %v1515_v12 = vmul.f32 0.044715, %v1514_v11 }
 0x6f7   :  { %v1516_v13 = vadd.f32 %v1515_v12, %v1511_v9  ;;  %v1711_v9 = vld [vmem:[%s2987_s6] sm:$0x3] }
 0x6f8   :  { %v1716_v10 = vrot.slane %v1711_v9, %v2386_v36  ;;  %v1720_v11 = vrot.slane %v1711_v9, %v1719_v8 }
 0x6f9   :  { %v1517_v14 = vmul.f32 0.7978846, %v1516_v13 }
 0x6fb   :  { %2227 = vtanh.f32 %v1517_v14 }
 0x708   :  { %v2228_v15 = vpop.eup %2227 }
 0x709   :  { %v1519_v17 = vadd.f32 1.0, %v2228_v15 }
 0x70b   :  { %v1520_v18 = vmul.f32 %v1519_v17, %v1512_v16 }
 0x70d   :  { %2209 = vmatpush3.msra.mxu1 %v1520_v18 }
 0x70e   :  { %2211 = vmatmul.mubr.msk.f32.vlgmr.msra.gmra.mxu1 %vm251_vm1, %v1521_v19  ;;  %1723 = vmatprep.subr.mxu1 %v1710_v20 }
 0x70f   :  { %1787 = vmatprep.mubr.f32.mxu1 %v2231_v0  ;;  %1724 = vmatpush1.msra.mxu1 %v1709_v21  ;;  %v1706_v0 = vld [vmem:[%s2986_s5 + $0xd8] sm:$0xff] }
 0x710   :  { %1725 = vmatprep.subr.mxu1 %v1708_v22 }
 0x711   :  { %1726 = vmatpush1.msra.mxu1 %v1707_v23 }
 0x712   :  { %1727 = vmatprep.subr.mxu1 %v1706_v0 }
 0x713   :  { %1728 = vmatpush1.msra.mxu1 %v1705_v24 }
 0x714   :  { %1729 = vmatprep.subr.mxu1 %v1704_v25 }
 0x715   :  { %1730 = vmatpush1.msra.mxu1 %v1703_v26 }
 0x716   :  { %1731 = vmatprep.subr.mxu1 %v1702_v27 }
 0x717   :  { %1732 = vmatpush1.msra.mxu1 %v1701_v28 }
 0x718   :  { %1733 = vmatprep.subr.mxu1 %v1700_v30 }
 0x719   :  { %1734 = vmatpush1.msra.mxu1 %v1699_v33 }
 0x71a   :  { %1735 = vmatprep.subr.mxu1 %v1698_v34 }
 0x71b   :  { %1736 = vmatpush1.msra.mxu1 %v1697_v35 }
 0x71c   :  { %1737 = vmatprep.subr.mxu1 %v1696_v37 }
 0x71d   :  { %1738 = vmatpush1.msra.mxu1 %v1695_v38 }
 0x71e   :  { %1739 = vmatprep.subr.mxu1 %v1694_v39 }
 0x71f   :  { %1740 = vmatpush1.msra.mxu1 %v1693_v40 }
 0x720   :  { %1741 = vmatprep.subr.mxu1 %v1692_v41 }
 0x721   :  { %1742 = vmatpush1.msra.mxu1 %v1691_v42 }
 0x722   :  { %1743 = vmatprep.subr.mxu1 %v1690_v43 }
 0x723   :  { %1744 = vmatpush1.msra.mxu1 %v1689_v44 }
 0x724   :  { %1745 = vmatprep.subr.mxu1 %v1688_v45 }
 0x725   :  { %1746 = vmatpush1.msra.mxu1 %v1687_v46 }
 0x726   :  { %1747 = vmatprep.subr.mxu1 %v1686_v47 }
 0x727   :  { %1748 = vmatpush1.msra.mxu1 %v1685_v48 }
 0x728   :  { %1749 = vmatprep.subr.mxu1 %v1684_v49 }
 0x729   :  { %1750 = vmatpush1.msra.mxu1 %v1683_v50 }
 0x72a   :  { %1751 = vmatprep.subr.mxu1 %v1682_v51 }
 0x72b   :  { %1752 = vmatpush1.msra.mxu1 %v1681_v52 }
 0x72c   :  { %1753 = vmatprep.subr.mxu1 %v1680_v53 }
 0x72d   :  { %1754 = vmatpush1.msra.mxu1 %v1679_v5 }
 0x7ce   :  { %v1593_v55 = vpop.f32.mrf.mxu1 }
 0x7cf   :  { %v1594_v56 = vadd.f32 %v1593_v55, %v1522_v54 }
 0x7d0   :  { %v2212_v57 = vpop.f32.mrf.mxu1 }
 0x7d1   :  { %v1598_v58 = vmul.f32 %v1594_v56, %v1594_v56  ;;  %v1597_v1 = vmul.f32 0.5, %v1594_v56 }
 0x7d3   :  { %v1599_v59 = vmul.f32 %v1598_v58, %v1594_v56 }
 0x7d5   :  { %v1600_v60 = vmul.f32 0.044715, %v1599_v59 }
 0x7d7   :  { %v1601_v61 = vadd.f32 %v1600_v60, %v1594_v56 }
 0x7d9   :  { %v1602_v62 = vmul.f32 0.7978846, %v1601_v61 }
 0x7db   :  { %2229 = vtanh.f32 %v1602_v62 }
 0x7e8   :  { %v2230_v63 = vpop.eup %2229 }
 0x7e9   :  { %v1604_v2 = vadd.f32 1.0, %v2230_v63 }
 0x7eb   :  { %v1605_v3 = vmul.f32 %v1604_v2, %v1597_v1 }
 0x7ed   :  { %2214 = vmatpush3.msra.mxu0 %v1605_v3 }
 0x7ee   :  { %2216 = vmatmul.mubr.msk.f32.vlgmr.msra.gmra.mxu0 %vm251_vm1, %v1523_v4 }
 0x8ae   :  { %v1675_v6 = vpop.f32.mrf.mxu0 }
 0x8af   :  { %1788 = vmatmul.mubr.f32.vlgmr.msra.gmra.mxu1 %v1675_v6 }
 0x8b0   :  { %v2217_v7 = vpop.f32.mrf.mxu0 }
 0x96f   :  { %v1789_v12 = vpop.f32.mrf.mxu1 }
 0x970   :  { %v1790_v14 = vadd.f32 %v1789_v12, %v1716_v10 }
 0x971   :  { %v1791_v13 = vpop.f32.mrf.mxu1 }
 0x972   :  { %v1792_v15 = vadd.f32 %v1791_v13, %v1720_v11 }
 0x974   :  { %v1796_v16 = vcombine.low %v1790_v14, %v1792_v15 }
 0x976   :  { %v1803_v17 = vrot.slane %v1796_v16, %v2382_v32 }
 0x978   :  { %v1810_v18 = vrot.slane %v1803_v17, %v2382_v32 }
 0x97a   :  { %1816 = vst.msk [vmem:[%s2988_s7] sm:$0x3] %vm1814_vm3, %v1810_v18 }

</bundles_post_ra>
